<compile_context>
chip_gen: v6e
topology: v6e:2x2x1
jax: 0.10.0
libtpu: 0.0.40
codegen_flags: <defaults>
</compile_context>

<pallas_src>
import functools

import jax
import jax.numpy as jnp
from jax.experimental import pallas as pl
from jax.experimental.pallas import tpu as pltpu

LANE = 128                               # vreg lane width
_DENSE_WEIGHT_BUDGET_BYTES = 24 << 20    # stay well under v7x's 64 MiB VMEM


def _round_up(x, m):
    return (x + m - 1) // m * m


# ---------------------------------------------------------------------------
# Pallas kernel: fused (matmul + bias [+ ReLU]) x num_layers, all in VMEM
# ---------------------------------------------------------------------------
def _fused_net_kernel(*refs, num_layers, mxu_dtype):
    """refs = (x, w_1, b_1, ..., w_L, b_L, out, act_scratch).

    All weights are lane-dense and zero-padded at init time, so padded lanes
    stay zero through bias+ReLU.  The input tile arrives in f32 and is cast
    to the MXU dtype in-kernel (no separate host cast/pad pass over HBM).
    """
    x_ref = refs[0]
    o_ref = refs[1 + 2 * num_layers]
    act_ref = refs[2 + 2 * num_layers]            # explicit VMEM staging buf

    h = x_ref[...].astype(mxu_dtype)              # (TM, K0)
    for layer in range(num_layers):
        w_ref = refs[1 + 2 * layer]
        b_ref = refs[2 + 2 * layer]
        acc = jnp.dot(h, w_ref[...], preferred_element_type=jnp.float32)
        acc = acc + b_ref[...]                    # (TM, N) + (1, N), f32 VPU
        if layer < num_layers - 1:
            n_out = w_ref.shape[1]
            # Stage the inter-layer activation through explicit VMEM scratch
            # so large M tiles don't spill the whole slab out of the vreg
            # file with compiler-chosen layouts/stores.
            act_ref[:, :n_out] = jnp.maximum(acc, 0.0).astype(mxu_dtype)
            h = act_ref[:, :n_out]
        else:
            o_ref[...] = acc.astype(o_ref.dtype)  # final layer: no ReLU


# ---------------------------------------------------------------------------
# Init-time lowering: Conv2d (VALID, stride s) -> dense matmul on NCHW-flat x
# ---------------------------------------------------------------------------
def conv_to_dense(weight, bias, h_in, w_in, stride):
    """Return (dense (Cin*H*W, OC*OH*OW), bias (OC*OH*OW,), OH, OW) such that
    for a single NCHW-flattened image x:
        x @ dense + bias  ==  NCHW-flattened Conv2d(x) output."""
    oc, cin, kh, kw = weight.shape
    oh = (h_in - kh) // stride + 1
    ow = (w_in - kw) // stride + 1
    oc_g, c_g, i_g, j_g, oh_g, ow_g = jnp.meshgrid(
        jnp.arange(oc), jnp.arange(cin), jnp.arange(kh), jnp.arange(kw),
        jnp.arange(oh), jnp.arange(ow), indexing="ij")
    rows = c_g * (h_in * w_in) + (oh_g * stride + i_g) * w_in + (ow_g * stride + j_g)
    cols = oc_g * (oh * ow) + oh_g * ow + ow_g
    vals = jnp.broadcast_to(weight[:, :, :, :, None, None], rows.shape)
    dense = jnp.zeros((cin * h_in * w_in, oc * oh * ow), jnp.float32)
    dense = dense.at[rows.ravel(), cols.ravel()].set(vals.ravel().astype(jnp.float32))
    bias_full = jnp.repeat(bias.astype(jnp.float32), oh * ow)
    return dense, bias_full, oh, ow


def prepare_fused_params(conv_params, fc_w, fc_b, input_shape,
                         mxu_dtype=jnp.bfloat16,
                         vmem_weight_budget=_DENSE_WEIGHT_BUDGET_BYTES):
    """One-time weight prep.

    Lowers convs to dense matmuls, chain-pads K/N to multiples of 128 and
    casts matmul operands to the MXU dtype (biases stay f32).

    INVARIANT (do not break when editing): all padded weight rows/columns and
    padded bias entries are exactly zero.  Kernel correctness (padded lanes
    staying zero through bias+ReLU, and the un-padded input K columns) relies
    on it.
    """
    cin, h, w = input_shape
    mats = []
    for (cw, cb, k, s) in conv_params:
        dense, bfull, oh, ow = conv_to_dense(cw, cb, h, w, s)
        mats.append((dense, bfull))
        cin, h, w = cw.shape[0], oh, ow
    # PyTorch Linear: y = x @ W^T + b; x is the NCHW flatten of the last conv
    # output, which is exactly the column ordering produced above.
    mats.append((fc_w.T.astype(jnp.float32), fc_b.astype(jnp.float32)))

    padded = []
    k_pad = _round_up(mats[0][0].shape[0], LANE)
    for dense, bfull in mats:
        kd, nd = dense.shape
        n_pad = _round_up(nd, LANE)
        wp = jnp.zeros((k_pad, n_pad), jnp.float32).at[:kd, :nd].set(dense)
        bp = jnp.zeros((1, n_pad), jnp.float32).at[0, :nd].set(bfull)
        padded.append((wp.astype(mxu_dtype), bp))
        k_pad = n_pad                      # next layer consumes this padded N

    total_bytes = sum(wp.size * jnp.dtype(mxu_dtype).itemsize + bp.size * 4
                      for wp, bp in padded)
    if total_bytes > vmem_weight_budget:
        # TODO(synk): for large feature maps (e.g. Atari 84x84) the dense
        # Toeplitz lowering blows VMEM and inflates layer-1 MXU FLOPs; switch
        # to a tiled im2col / shifted-matmul K-reduction (grid reduction axis
        # + f32 accumulator via pl.when init/finalize) instead.
        raise NotImplementedError(
            f"Dense conv lowering needs {total_bytes / 2**20:.1f} MiB of "
            f"resident weights (> {vmem_weight_budget / 2**20:.0f} MiB "
            "budget); use a tiled im2col / shifted-matmul path instead.")
    return padded


# ---------------------------------------------------------------------------
# Batch-tile selection: dtype- and generation-aware
# ---------------------------------------------------------------------------
def _pick_tile_m(n, mxu_dtype):
    # One packed vreg holds [16,128] bf16 / [8,128] f32: round the batch tile
    # to full packed sublanes so stores are not sub-tile/masked.
    gran = 16 if jnp.dtype(mxu_dtype).itemsize == 2 else 8
    try:
        kind = jax.devices()[0].device_kind.lower()
    except Exception:
        kind = ""
    # v2-v5 MXUs are 128x128; v6e/v7x are 2x256x256 -> bigger M tile fills
    # the systolic array and halves the number of ~0.35 us grid steps.
    cap = 128 if any(g in kind for g in ("v2", "v3", "v4", "v5")) else 256
    tile = min(cap, _round_up(max(n, 1), gran))
    # v7x has 2 TensorCores sharing the "parallel" grid axis: ensure >= 2
    # grid steps when the batch is big enough to split without starving MXU.
    if "v7" in kind and tile > 128 and n > 128 and pl.cdiv(n, tile) < 2:
        tile = 128
    return tile


# ---------------------------------------------------------------------------
# Forward: one fused pallas_call for the whole network
# ---------------------------------------------------------------------------
def fused_forward(x_nchw, padded_params, out_features, mxu_dtype=jnp.bfloat16):
    n = x_nchw.shape[0]
    x_flat = x_nchw.reshape(n, -1).astype(jnp.float32)   # NCHW flatten (view)
    k_real = x_flat.shape[1]
    k0 = padded_params[0][0].shape[0]
    if k_real != k0:
        # Rare: only when Cin*H*W is not already a multiple of 128.  Padded
        # weight rows are zero, so zero-filled columns are inert.
        x_flat = jnp.pad(x_flat, ((0, 0), (0, k0 - k_real)))

    n_last = padded_params[-1][0].shape[1]
    num_layers = len(padded_params)
    tile_m = _pick_tile_m(n, mxu_dtype)
    grid_m = pl.cdiv(n, tile_m)        # ragged last tile; OOB rows only ever
                                       # produce garbage in masked-out writes.

    inter_ns = [wp.shape[1] for wp, _ in padded_params[:-1]] or [LANE]
    act_cols = max(inter_ns)

    w_bytes = jnp.dtype(mxu_dtype).itemsize
    flops = 0
    bytes_accessed = grid_m * tile_m * k0 * 4 + n * n_last * 4
    for wp, bp in padded_params:
        flops += 2 * grid_m * tile_m * wp.shape[0] * wp.shape[1]
        bytes_accessed += wp.size * w_bytes + bp.size * 4

    kernel = functools.partial(_fused_net_kernel, num_layers=num_layers,
                               mxu_dtype=mxu_dtype)

    in_specs = [pl.BlockSpec((tile_m, k0), lambda i: (i, 0))]
    flat_wb = []
    for wp, bp in padded_params:
        # Constant index_map -> block never changes across the grid, so
        # Pallas keeps it resident instead of re-DMAing every step.
        # TODO(synk): pipeline_mode=pl.Buffered(1) here once verified on the
        # target jax version (single-buffer contract for constant blocks).
        in_specs.append(pl.BlockSpec(wp.shape, lambda i: (0, 0)))
        in_specs.append(pl.BlockSpec(bp.shape, lambda i: (0, 0)))
        flat_wb += [wp, bp]

    out = pl.pallas_call(
        kernel,
        out_shape=jax.ShapeDtypeStruct((n, n_last), jnp.float32),
        grid=(grid_m,),
        in_specs=in_specs,
        out_specs=pl.BlockSpec((tile_m, n_last), lambda i: (i, 0)),
        scratch_shapes=[pltpu.VMEM((tile_m, act_cols), mxu_dtype)],
        compiler_params=pltpu.CompilerParams(
            dimension_semantics=("parallel",)),
        cost_estimate=pl.CostEstimate(flops=flops, transcendentals=0,
                                      bytes_accessed=bytes_accessed),
    )(x_flat, *flat_wb)

    return out[:, :out_features]


# ---------------------------------------------------------------------------
# Deterministic parameters (mirrors the torch module's __init__ shapes)
# ---------------------------------------------------------------------------
def build_params(key, input_shape, conv_layers, action_space_n):
    in_c, h, w = input_shape
    conv_params = []
    for (oc, k, s) in conv_layers:
        key, kw_, kb_ = jax.random.split(key, 3)
        W = jax.random.normal(kw_, (oc, in_c, k, k), jnp.float32) * 0.1
        b = jax.random.normal(kb_, (oc,), jnp.float32) * 0.1
        conv_params.append((W, b, k, s))
        in_c = oc
        h = (h - k) // s + 1
        w = (w - k) // s + 1
    linear_input_size = in_c * h * w      # == layers_size() in the torch module
    key, kfw, kfb = jax.random.split(key, 3)
    fc_w = jax.random.normal(kfw, (action_space_n, linear_input_size), jnp.float32) * 0.1
    fc_b = jax.random.normal(kfb, (action_space_n,), jnp.float32) * 0.1
    return conv_params, fc_w, fc_b


# Pure-JAX f32 reference (mirrors ConvolutionalNetwork.forward exactly)
def reference_forward(x_nchw, conv_params, fc_w, fc_b):
    x = x_nchw.astype(jnp.float32)
    for (w, b, k, s) in conv_params:
        x = jax.lax.conv_general_dilated(
            x, w, window_strides=(s, s), padding="VALID",
            dimension_numbers=("NCHW", "OIHW", "NCHW"),
            precision=jax.lax.Precision.HIGHEST)
        x = jnp.maximum(x + b[None, :, None, None], 0.0)
    flat = x.reshape(x.shape[0], -1)
    return jnp.dot(flat, fc_w.T, precision=jax.lax.Precision.HIGHEST) + fc_b


if __name__ == "__main__":
    # Small, module-consistent configuration.
    input_shape = (4, 16, 16)              # (C, H, W)
    conv_layers = [(8, 3, 2), (16, 3, 2)]  # (out_channels, kernel_size, stride)
    action_space_n = 5
    batch = 2

    key = jax.random.PRNGKey(0)
    key, kx = jax.random.split(key)
    x = jax.random.normal(kx, (batch,) + input_shape, jnp.float32)   # NCHW

    conv_params, fc_w, fc_b = build_params(key, input_shape, conv_layers,
                                           action_space_n)
    fused_params = prepare_fused_params(conv_params, fc_w, fc_b, input_shape)

    fwd = jax.jit(lambda xb: fused_forward(xb, fused_params, action_space_n))
    out = jax.block_until_ready(fwd(x))

    assert out.shape == (batch, action_space_n), out.shape
    assert out.dtype == jnp.float32, out.dtype

    # bf16 MXU inputs + f32 accumulation vs the pure-f32 XLA reference.
    ref = reference_forward(x, conv_params, fc_w, fc_b)
    max_err = float(jnp.max(jnp.abs(out - ref)))
    assert max_err < 5e-2, f"max abs error {max_err}"

    print("KERNEL_OK")
</pallas_src>

<mosaic_0001>
module attributes {stable_mosaic.version = 11 : i64} {
  func.func @_fused_net_kernel(%arg0: i32, %arg1: memref<16x1024xf32, #tpu.memory_space<vmem>>, %arg2: memref<1024x512xbf16, #tpu.memory_space<vmem>>, %arg3: memref<1x512xf32, #tpu.memory_space<vmem>>, %arg4: memref<512x256xbf16, #tpu.memory_space<vmem>>, %arg5: memref<1x256xf32, #tpu.memory_space<vmem>>, %arg6: memref<256x128xbf16, #tpu.memory_space<vmem>>, %arg7: memref<1x128xf32, #tpu.memory_space<vmem>>, %arg8: memref<16x128xf32, #tpu.memory_space<vmem>>, %arg9: memref<16x512xbf16, #tpu.memory_space<vmem>>) attributes {dimension_semantics = [#tpu.dimension_semantics<parallel>], iteration_bounds = array<i64: 1>, scalar_prefetch = 0 : i64, scratch_operands = 1 : i64, tpu.core_type = #tpu.core_type<tc>, window_params = [{transform_indices = @transform_0, window_bounds = array<i64: 16, 1024>}, {pipeline_mode = #tpu.pipeline_mode<synchronous>, transform_indices = @transform_1, window_bounds = array<i64: 1024, 512>}, {pipeline_mode = #tpu.pipeline_mode<synchronous>, transform_indices = @transform_2, window_bounds = array<i64: 1, 512>}, {pipeline_mode = #tpu.pipeline_mode<synchronous>, transform_indices = @transform_3, window_bounds = array<i64: 512, 256>}, {pipeline_mode = #tpu.pipeline_mode<synchronous>, transform_indices = @transform_4, window_bounds = array<i64: 1, 256>}, {pipeline_mode = #tpu.pipeline_mode<synchronous>, transform_indices = @transform_5, window_bounds = array<i64: 256, 128>}, {pipeline_mode = #tpu.pipeline_mode<synchronous>, transform_indices = @transform_6, window_bounds = array<i64: 1, 128>}, {transform_indices = @transform_7, window_bounds = array<i64: 16, 128>}]} {
    %c0 = arith.constant 0 : index
    %c0_0 = arith.constant 0 : index
    %0 = vector.load %arg1[%c0, %c0_0] : memref<16x1024xf32, #tpu.memory_space<vmem>>, vector<16x1024xf32>
    %1 = arith.truncf %0 : vector<16x1024xf32> to vector<16x1024xbf16>
    %c0_1 = arith.constant 0 : index
    %c0_2 = arith.constant 0 : index
    %2 = vector.load %arg2[%c0_1, %c0_2] : memref<1024x512xbf16, #tpu.memory_space<vmem>>, vector<1024x512xbf16>
    %cst = arith.constant dense<0.000000e+00> : vector<16x512xf32>
    %3 = tpu.matmul %1, %2, %cst {dimension_numbers = #tpu.dot_dimension_numbers<[1], [0], [0], [1], [0, 0, 1, 1], [], []>} : vector<16x1024xbf16>, vector<1024x512xbf16>, vector<16x512xf32> -> vector<16x512xf32>
    %c0_3 = arith.constant 0 : index
    %c0_4 = arith.constant 0 : index
    %4 = vector.load %arg3[%c0_3, %c0_4] : memref<1x512xf32, #tpu.memory_space<vmem>>, vector<1x512xf32>
    %5 = vector.broadcast %4 : vector<1x512xf32> to vector<16x512xf32>
    %6 = arith.addf %3, %5 : vector<16x512xf32>
    %cst_5 = arith.constant 0.000000e+00 : f32
    %7 = vector.broadcast %cst_5 : f32 to vector<16x512xf32>
    %8 = arith.maximumf %6, %7 : vector<16x512xf32>
    %9 = arith.truncf %8 : vector<16x512xf32> to vector<16x512xbf16>
    %c0_6 = arith.constant 0 : index
    %c0_7 = arith.constant 0 : index
    %10 = vector.load %arg9[%c0_6, %c0_7] : memref<16x512xbf16, #tpu.memory_space<vmem>>, vector<16x512xbf16>
    tpu.vector_store %arg9[%c0_6, %c0_7], %9 {strides = array<i32>} : memref<16x512xbf16, #tpu.memory_space<vmem>>, vector<16x512xbf16>,
    %c0_8 = arith.constant 0 : index
    %c0_9 = arith.constant 0 : index
    %11 = vector.load %arg9[%c0_8, %c0_9] : memref<16x512xbf16, #tpu.memory_space<vmem>>, vector<16x512xbf16>
    %c0_10 = arith.constant 0 : index
    %c0_11 = arith.constant 0 : index
    %12 = vector.load %arg4[%c0_10, %c0_11] : memref<512x256xbf16, #tpu.memory_space<vmem>>, vector<512x256xbf16>
    %cst_12 = arith.constant dense<0.000000e+00> : vector<16x256xf32>
    %13 = tpu.matmul %11, %12, %cst_12 {dimension_numbers = #tpu.dot_dimension_numbers<[1], [0], [0], [1], [0, 0, 1, 1], [], []>} : vector<16x512xbf16>, vector<512x256xbf16>, vector<16x256xf32> -> vector<16x256xf32>
    %c0_13 = arith.constant 0 : index
    %c0_14 = arith.constant 0 : index
    %14 = vector.load %arg5[%c0_13, %c0_14] : memref<1x256xf32, #tpu.memory_space<vmem>>, vector<1x256xf32>
    %15 = vector.broadcast %14 : vector<1x256xf32> to vector<16x256xf32>
    %16 = arith.addf %13, %15 : vector<16x256xf32>
    %cst_15 = arith.constant 0.000000e+00 : f32
    %17 = vector.broadcast %cst_15 : f32 to vector<16x256xf32>
    %18 = arith.maximumf %16, %17 : vector<16x256xf32>
    %19 = arith.truncf %18 : vector<16x256xf32> to vector<16x256xbf16>
    %c0_16 = arith.constant 0 : index
    %c0_17 = arith.constant 0 : index
    %20 = vector.load %arg9[%c0_16, %c0_17] : memref<16x512xbf16, #tpu.memory_space<vmem>>, vector<16x256xbf16>
    tpu.vector_store %arg9[%c0_16, %c0_17], %19 {strides = array<i32>} : memref<16x512xbf16, #tpu.memory_space<vmem>>, vector<16x256xbf16>,
    %c0_18 = arith.constant 0 : index
    %c0_19 = arith.constant 0 : index
    %21 = vector.load %arg9[%c0_18, %c0_19] : memref<16x512xbf16, #tpu.memory_space<vmem>>, vector<16x256xbf16>
    %c0_20 = arith.constant 0 : index
    %c0_21 = arith.constant 0 : index
    %22 = vector.load %arg6[%c0_20, %c0_21] : memref<256x128xbf16, #tpu.memory_space<vmem>>, vector<256x128xbf16>
    %cst_22 = arith.constant dense<0.000000e+00> : vector<16x128xf32>
    %23 = tpu.matmul %21, %22, %cst_22 {dimension_numbers = #tpu.dot_dimension_numbers<[1], [0], [0], [1], [0, 0, 1, 1], [], []>} : vector<16x256xbf16>, vector<256x128xbf16>, vector<16x128xf32> -> vector<16x128xf32>
    %c0_23 = arith.constant 0 : index
    %c0_24 = arith.constant 0 : index
    %24 = vector.load %arg7[%c0_23, %c0_24] : memref<1x128xf32, #tpu.memory_space<vmem>>, vector<1x128xf32>
    %25 = vector.broadcast %24 : vector<1x128xf32> to vector<16x128xf32>
    %26 = arith.addf %23, %25 : vector<16x128xf32>
    %c0_25 = arith.constant 0 : index
    %c0_26 = arith.constant 0 : index
    %27 = vector.load %arg8[%c0_25, %c0_26] : memref<16x128xf32, #tpu.memory_space<vmem>>, vector<16x128xf32>
    tpu.vector_store %arg8[%c0_25, %c0_26], %26 {strides = array<i32>} : memref<16x128xf32, #tpu.memory_space<vmem>>, vector<16x128xf32>,
    return
  }
  func.func @transform_0(%arg0: i32) -> (i32, i32) {
    %c0_i32 = arith.constant 0 : i32
    %c0_i32_0 = arith.constant 0 : i32
    return %arg0, %c0_i32 : i32, i32
  }
  func.func @transform_1(%arg0: i32) -> (i32, i32) {
    %c0_i32 = arith.constant 0 : i32
    %c0_i32_0 = arith.constant 0 : i32
    %c0_i32_1 = arith.constant 0 : i32
    return %c0_i32, %c0_i32_0 : i32, i32
  }
  func.func @transform_2(%arg0: i32) -> (i32, i32) {
    %c0_i32 = arith.constant 0 : i32
    %c0_i32_0 = arith.constant 0 : i32
    %c0_i32_1 = arith.constant 0 : i32
    return %c0_i32, %c0_i32_0 : i32, i32
  }
  func.func @transform_3(%arg0: i32) -> (i32, i32) {
    %c0_i32 = arith.constant 0 : i32
    %c0_i32_0 = arith.constant 0 : i32
    %c0_i32_1 = arith.constant 0 : i32
    return %c0_i32, %c0_i32_0 : i32, i32
  }
  func.func @transform_4(%arg0: i32) -> (i32, i32) {
    %c0_i32 = arith.constant 0 : i32
    %c0_i32_0 = arith.constant 0 : i32
    %c0_i32_1 = arith.constant 0 : i32
    return %c0_i32, %c0_i32_0 : i32, i32
  }
  func.func @transform_5(%arg0: i32) -> (i32, i32) {
    %c0_i32 = arith.constant 0 : i32
    %c0_i32_0 = arith.constant 0 : i32
    %c0_i32_1 = arith.constant 0 : i32
    return %c0_i32, %c0_i32_0 : i32, i32
  }
  func.func @transform_6(%arg0: i32) -> (i32, i32) {
    %c0_i32 = arith.constant 0 : i32
    %c0_i32_0 = arith.constant 0 : i32
    %c0_i32_1 = arith.constant 0 : i32
    return %c0_i32, %c0_i32_0 : i32, i32
  }
  func.func @transform_7(%arg0: i32) -> (i32, i32) {
    %c0_i32 = arith.constant 0 : i32
    %c0_i32_0 = arith.constant 0 : i32
    return %arg0, %c0_i32 : i32, i32
  }
}

</mosaic_0001>

<bundles_post_ra>
// kernel: _lambda_.1
= control target key start
LH: loop header
LB: loop body
LE: loop exit
PB: predicated region body
PF: predicated region fallthrough
CT: control target
= control target key end

     0   :  { %12 = vsyncpa [#allocation4], 0  ;;  %s4172_s0 = inlined_call_operand.vmem [shape: f32[2,1024], index: 0, kind: input, shape index: {}]   ;;  %s4173_s1 = inlined_call_operand.hbm [shape: bf16[1024,512], index: 1, kind: input, shape index: {}]   ;;  %s4174_s2 = inlined_call_operand.vmem [shape: f32[1,512], index: 2, kind: input, shape index: {}]   ;;  %s4175_s3 = inlined_call_operand.hbm [shape: bf16[512,256], index: 3, kind: input, shape index: {}]   ;;  %s4176_s4 = inlined_call_operand.vmem [shape: f32[1,256], index: 4, kind: input, shape index: {}]   ;;  %s4177_s5 = inlined_call_operand.vmem [shape: bf16[256,128], index: 5, kind: input, shape index: {}]   ;;  %s4178_s6 = inlined_call_operand.vmem [shape: f32[1,128], index: 6, kind: input, shape index: {}]   ;;  %s4179_s7 = inlined_call_operand.hbm [shape: f32[2,128], index: 7, kind: output, shape index: {}]  }
   0x1   :  { %13 = vsyncpa [#allocation7], 0 }
   0x2   :  { %14 = vsyncpa [#allocation5], 0  ;;  %s3905_s24 = smov [#allocation3]  }
   0x3   :  { %s22_s25 = sshll.u32 %s3905_s24, 4  ;;  %s23_s25 = int_to_ptr.vmem [resolvable:$true] %s22_s25 }
   0x4   :  { %s3847_s26 = scalar_lea.vmem %s23_s25, 32768  ;;  %p3852_p1 = scmp.lt.s32.totalorder %s23_s25, %s23_s25 }
   0x5   :  { %p3848_p0 = scmp.ne.s32.totalorder %s23_s25, %s3847_s26  ;;  %p3853_p2 = scmp.lt.s32.totalorder %s3847_s26, %s3847_s26 }
   0x7   :  { %p3854_p3 = por %p3853_p2, %p3852_p1 }
   0x9   :  { %p3855_p4 = pnand %p3854_p3, %p3848_p0 }
   0xb   :  { %3858 = shalt.err (!%p3855_p4)
}
   0xc   :  { %s3906_s27 = smov 256   ;;  %s3907_s28 = smov 16  }
   0xd   :  { %28 = dma.hbm_to_vmem [thread:$0]  %s4173_s1, 32768, %s23_s25, [#allocation4], %s3906_s27, %s3906_s27, %s3907_s28  }
   0xe   :  { %s3908_s8 = smov [#allocation6]  }
   0xf   :  { %s36_s9 = sshll.u32 %s3908_s8, 4  ;;  %s37_s9 = int_to_ptr.vmem [resolvable:$true] %s36_s9 }
  0x10   :  { %s3867_s10 = scalar_lea.vmem %s37_s9, 8192  ;;  %p3872_p6 = scmp.lt.s32.totalorder %s37_s9, %s37_s9 }
  0x11   :  { %p3868_p5 = scmp.ne.s32.totalorder %s37_s9, %s3867_s10  ;;  %p3873_p7 = scmp.lt.s32.totalorder %s3867_s10, %s3867_s10 }
  0x13   :  { %p3874_p8 = por %p3873_p7, %p3872_p6 }
  0x15   :  { %p3875_p9 = pnand %p3874_p8, %p3868_p5 }
  0x17   :  { %3878 = shalt.err (!%p3875_p9)
}
  0x18   :  { %s3909_s11 = smov 128   ;;  %s3910_s12 = smov 8  }
  0x19   :  { %42 = dma.hbm_to_vmem [thread:$0]  %s4175_s3, 8192, %s37_s9, [#allocation7], %s3909_s11, %s3909_s11, %s3910_s12  }
  0x1a   :  { %3899 = dma.done.wait [#allocation4], 32768  }
  0x1b   :  { %3900 = vsyncadd [#allocation4], 4294934528 }
  0x1c   :  { %3901 = dma.done.wait [#allocation7], 8192  }
  0x1d   :  { %3902 = vsyncadd [#allocation7], 4294959104  ;;  %v3319_v0 = vld [vmem:[#allocation3 + $0xe4] ss:$16 sps:$4 sm:$0xff]   ;;  %v3323_v2 = vld [vmem:[#allocation3 + $0xe0] ss:$16 sps:$4 sm:$0xff]   ;;  %v95_v41 = vlaneseq }
  0x1e   :  { %v3321_v1 = vld [vmem:[#allocation3 + $0x2e4] ss:$16 sps:$4 sm:$0xff]   ;;  %1814 = vmatprep.subr.bf16.mxu0 %v3319_v0  ;;  %v3324_v3 = vld [vmem:[#allocation3 + $0x2e0] ss:$16 sps:$4 sm:$0xff]   ;;  %v3911_v39 = vmov 1983009808  }
  0x1f   :  { %1857 = vmatprep.subr.bf16.mxu1 %v3321_v1  ;;  %v3325_v4 = vld [vmem:[#allocation3 + $0xc4] ss:$16 sps:$4 sm:$0xff]   ;;  %1815 = vmatpush1.bf16.msra.mxu0 %v3323_v2  ;;  %v3329_v6 = vld [vmem:[#allocation3 + $0xc0] ss:$16 sps:$4 sm:$0xff]   ;;  %v93_v40 = vunpack.c.l.s4 %v3911_v39  ;;  %v3961_v48 = vshrl.u32 %v95_v41, 7 }
  0x20   :  { %1858 = vmatpush1.bf16.msra.mxu1 %v3324_v3  ;;  %v3327_v5 = vld [vmem:[#allocation3 + $0x2c4] ss:$16 sps:$4 sm:$0xff]   ;;  %1816 = vmatprep.subr.bf16.mxu0 %v3325_v4  ;;  %v3330_v7 = vld [vmem:[#allocation3 + $0x2c0] ss:$16 sps:$4 sm:$0xff]  }
  0x21   :  { %1859 = vmatprep.subr.bf16.mxu1 %v3327_v5  ;;  %v3331_v8 = vld [vmem:[#allocation3 + $0xa4] ss:$16 sps:$4 sm:$0xff]   ;;  %v3335_v10 = vld [vmem:[#allocation3 + $0xa0] ss:$16 sps:$4 sm:$0xff]   ;;  %v94_v47 = vunpack.c.0.s8 %v93_v40 }
  0x22   :  { %v3333_v9 = vld [vmem:[#allocation3 + $0x2a4] ss:$16 sps:$4 sm:$0xff]   ;;  %v3336_v11 = vld [vmem:[#allocation3 + $0x2a0] ss:$16 sps:$4 sm:$0xff]  }
  0x23   :  { %1817 = vmatpush1.bf16.msra.mxu0 %v3329_v6  ;;  %v3337_v12 = vld [vmem:[#allocation3 + $0x84] ss:$16 sps:$4 sm:$0xff]   ;;  %v3341_v14 = vld [vmem:[#allocation3 + $0x80] ss:$16 sps:$4 sm:$0xff]   ;;  %v3964_v55 = vsub.s32 %v94_v47, %v3961_v48 }
  0x24   :  { %1860 = vmatpush1.bf16.msra.mxu1 %v3330_v7  ;;  %1818 = vmatprep.subr.bf16.mxu0 %v3331_v8  ;;  %v3339_v13 = vld [vmem:[#allocation3 + $0x284] ss:$16 sps:$4 sm:$0xff]   ;;  %v3342_v15 = vld [vmem:[#allocation3 + $0x280] ss:$16 sps:$4 sm:$0xff]  }
  0x25   :  { %1861 = vmatprep.subr.bf16.mxu1 %v3333_v9  ;;  %v3343_v16 = vld [vmem:[#allocation3 + $0x64] ss:$16 sps:$4 sm:$0xff]   ;;  %v3347_v18 = vld [vmem:[#allocation3 + $0x60] ss:$16 sps:$4 sm:$0xff]  }
  0x26   :  { %v3345_v17 = vld [vmem:[#allocation3 + $0x264] ss:$16 sps:$4 sm:$0xff]   ;;  %v3348_v19 = vld [vmem:[#allocation3 + $0x260] ss:$16 sps:$4 sm:$0xff]  }
  0x27   :  { %1819 = vmatpush1.bf16.msra.mxu0 %v3335_v10  ;;  %v3349_v20 = vld [vmem:[#allocation3 + $0x44] ss:$16 sps:$4 sm:$0xff]   ;;  %v3353_v22 = vld [vmem:[#allocation3 + $0x40] ss:$16 sps:$4 sm:$0xff]  }
  0x28   :  { %1862 = vmatpush1.bf16.msra.mxu1 %v3336_v11  ;;  %1820 = vmatprep.subr.bf16.mxu0 %v3337_v12  ;;  %v3351_v21 = vld [vmem:[#allocation3 + $0x244] ss:$16 sps:$4 sm:$0xff]   ;;  %v3354_v23 = vld [vmem:[#allocation3 + $0x240] ss:$16 sps:$4 sm:$0xff]  }
  0x29   :  { %1863 = vmatprep.subr.bf16.mxu1 %v3339_v13  ;;  %v3355_v24 = vld [vmem:[#allocation3 + $0x24] ss:$16 sps:$4 sm:$0xff]   ;;  %v3359_v26 = vld [vmem:[#allocation3 + $0x20] ss:$16 sps:$4 sm:$0xff]  }
  0x2a   :  { %v3357_v25 = vld [vmem:[#allocation3 + $0x224] ss:$16 sps:$4 sm:$0xff]   ;;  %v3360_v27 = vld [vmem:[#allocation3 + $0x220] ss:$16 sps:$4 sm:$0xff]  }
  0x2b   :  { %1821 = vmatpush1.bf16.msra.mxu0 %v3341_v14  ;;  %v3361_v28 = vld [vmem:[#allocation3 + $0x4] ss:$16 sps:$4 sm:$0xff]   ;;  %v3365_v30 = vld [vmem:[#allocation3] ss:$16 sps:$4 sm:$0xff]  }
  0x2c   :  { %1864 = vmatpush1.bf16.msra.mxu1 %v3342_v15  ;;  %1822 = vmatprep.subr.bf16.mxu0 %v3343_v16  ;;  %v3363_v29 = vld [vmem:[#allocation3 + $0x204] ss:$16 sps:$4 sm:$0xff]   ;;  %v3366_v31 = vld [vmem:[#allocation3 + $0x200] ss:$16 sps:$4 sm:$0xff]  }
  0x2d   :  { %1865 = vmatprep.subr.bf16.mxu1 %v3345_v17  ;;  %v3367_v32 = vld [vmem:[#allocation3 + $0x1e4] ss:$16 sps:$4 sm:$0xff]   ;;  %v3371_v34 = vld [vmem:[#allocation3 + $0x1e0] ss:$16 sps:$4 sm:$0xff]  }
  0x2e   :  { %v3369_v33 = vld [vmem:[#allocation3 + $0x3e4] ss:$16 sps:$4 sm:$0xff]   ;;  %v3372_v35 = vld [vmem:[#allocation3 + $0x3e0] ss:$16 sps:$4 sm:$0xff]  }
  0x2f   :  { %1823 = vmatpush1.bf16.msra.mxu0 %v3347_v18  ;;  %v3373_v36 = vld [vmem:[#allocation3 + $0x1c4] ss:$16 sps:$4 sm:$0xff]   ;;  %v3377_v38 = vld [vmem:[#allocation3 + $0x1c0] ss:$16 sps:$4 sm:$0xff]  }
  0x30   :  { %1866 = vmatpush1.bf16.msra.mxu1 %v3348_v19  ;;  %1824 = vmatprep.subr.bf16.mxu0 %v3349_v20  ;;  %v3375_v37 = vld [vmem:[#allocation3 + $0x3c4] ss:$16 sps:$4 sm:$0xff]   ;;  %v3378_v42 = vld [vmem:[#allocation3 + $0x3c0] ss:$16 sps:$4 sm:$0xff]  }
  0x31   :  { %1867 = vmatprep.subr.bf16.mxu1 %v3351_v21  ;;  %v3379_v43 = vld [vmem:[#allocation3 + $0x1a4] ss:$16 sps:$4 sm:$0xff]   ;;  %v3383_v45 = vld [vmem:[#allocation3 + $0x1a0] ss:$16 sps:$4 sm:$0xff]  }
  0x32   :  { %v3381_v44 = vld [vmem:[#allocation3 + $0x3a4] ss:$16 sps:$4 sm:$0xff]   ;;  %v3384_v46 = vld [vmem:[#allocation3 + $0x3a0] ss:$16 sps:$4 sm:$0xff]  }
  0x33   :  { %1825 = vmatpush1.bf16.msra.mxu0 %v3353_v22  ;;  %v3385_v49 = vld [vmem:[#allocation3 + $0x184] ss:$16 sps:$4 sm:$0xff]   ;;  %v3389_v51 = vld [vmem:[#allocation3 + $0x180] ss:$16 sps:$4 sm:$0xff]  }
  0x34   :  { %1868 = vmatpush1.bf16.msra.mxu1 %v3354_v23  ;;  %1826 = vmatprep.subr.bf16.mxu0 %v3355_v24  ;;  %v3387_v50 = vld [vmem:[#allocation3 + $0x384] ss:$16 sps:$4 sm:$0xff]   ;;  %v3390_v52 = vld [vmem:[#allocation3 + $0x380] ss:$16 sps:$4 sm:$0xff]  }
  0x35   :  { %1869 = vmatprep.subr.bf16.mxu1 %v3357_v25  ;;  %v3391_v53 = vld [vmem:[#allocation3 + $0x164] ss:$16 sps:$4 sm:$0xff]   ;;  %v3415_v56 = vld [vmem:[%s4172_s0] ss:$16 sps:$4 sm:$0xff]  }
  0x36   :  { %v3393_v54 = vld [vmem:[#allocation3 + $0x364] ss:$16 sps:$4 sm:$0xff]   ;;  %v3417_v57 = vld [vmem:[%s4172_s0 + $0x20] ss:$16 sps:$4 sm:$0xff]   ;;  %v98_v63 = vrot.slane %v3415_v56, %v3964_v55 }
  0x37   :  { %1827 = vmatpush1.bf16.msra.mxu0 %v3359_v26  ;;  %v3395_v58 = vld [vmem:[#allocation3 + $0x160] ss:$16 sps:$4 sm:$0xff]   ;;  %v3423_v62 = vld [vmem:[%s4172_s0 + $0x4] ss:$16 sps:$4 sm:$0xff]   ;;  %v112_v0 = vrot.slane %v3417_v57, %v3964_v55 }
  0x38   :  { %1870 = vmatpush1.bf16.msra.mxu1 %v3360_v27  ;;  %1828 = vmatprep.subr.bf16.mxu0 %v3361_v28  ;;  %v3396_v59 = vld [vmem:[#allocation3 + $0x360] ss:$16 sps:$4 sm:$0xff]   ;;  %v3424_v1 = vld [vmem:[%s4172_s0 + $0x24] ss:$16 sps:$4 sm:$0xff]   ;;  %v105_v7 = vrot.slane %v3423_v62, %v3964_v55 }
  0x39   :  { %1871 = vmatprep.subr.bf16.mxu1 %v3363_v29  ;;  %v3419_v60 = vld [vmem:[%s4172_s0 + $0x40] ss:$16 sps:$4 sm:$0xff]   ;;  %v3425_v2 = vld [vmem:[%s4172_s0 + $0x44] ss:$16 sps:$4 sm:$0xff]   ;;  %v121_v9 = vcombine.high %v98_v63, %v112_v0  ;;  %v119_v10 = vrot.slane %v3424_v1, %v3964_v55  ;;  %v120_v28 = vcombine.low %v98_v63, %v112_v0 }
  0x3a   :  { %v3421_v61 = vld [vmem:[%s4172_s0 + $0x60] ss:$16 sps:$4 sm:$0xff]   ;;  %v3426_v3 = vld [vmem:[%s4172_s0 + $0x64] ss:$16 sps:$4 sm:$0xff]   ;;  %v170_v5 = vrot.slane %v3419_v60, %v3964_v55  ;;  %v177_v11 = vrot.slane %v3425_v2, %v3964_v55 }
  0x3b   :  { %1829 = vmatpush1.bf16.msra.mxu0 %v3365_v30  ;;  %v3397_v4 = vld [vmem:[#allocation3 + $0x144] ss:$16 sps:$4 sm:$0xff]   ;;  %v184_v6 = vrot.slane %v3421_v61, %v3964_v55  ;;  %v191_v13 = vrot.slane %v3426_v3, %v3964_v55  ;;  %v3401_v14 = vld [vmem:[#allocation3 + $0x140] ss:$16 sps:$4 sm:$0xff]   ;;  %v123_v16 = vcombine.high %v105_v7, %v119_v10  ;;  %v122_v30 = vcombine.low %v105_v7, %v119_v10  ;;  %v3525_v7 = vld [vmem:[%s4172_s0 + $0x28] ss:$16 sps:$4 sm:$0xff]  }
  0x3c   :  { %1872 = vmatpush1.bf16.msra.mxu1 %v3366_v31  ;;  %1830 = vmatprep.subr.bf16.mxu0 %v3367_v32  ;;  %v3399_v8 = vld [vmem:[#allocation3 + $0x344] ss:$16 sps:$4 sm:$0xff]   ;;  %v3402_v15 = vld [vmem:[#allocation3 + $0x340] ss:$16 sps:$4 sm:$0xff]   ;;  %v3527_v10 = vld [vmem:[%s4172_s0 + $0x48] ss:$16 sps:$4 sm:$0xff]  }
  0x3d   :  { %1873 = vmatprep.subr.bf16.mxu1 %v3369_v33  ;;  %v193_v12 = vcombine.high %v170_v5, %v184_v6  ;;  %v3403_v17 = vld [vmem:[#allocation3 + $0x124] ss:$16 sps:$4 sm:$0xff]   ;;  %v195_v19 = vcombine.high %v177_v11, %v191_v13  ;;  %v3407_v22 = vld [vmem:[#allocation3 + $0x120] ss:$16 sps:$4 sm:$0xff]   ;;  %v192_v29 = vcombine.low %v170_v5, %v184_v6  ;;  %v194_v31 = vcombine.low %v177_v11, %v191_v13  ;;  %v3523_v6 = vld [vmem:[%s4172_s0 + $0x8] ss:$16 sps:$4 sm:$0xff]  }
  0x3e   :  { %v3405_v20 = vld [vmem:[#allocation3 + $0x324] ss:$16 sps:$4 sm:$0xff]   ;;  %v3408_v23 = vld [vmem:[#allocation3 + $0x320] ss:$16 sps:$4 sm:$0xff]   ;;  %v3529_v11 = vld [vmem:[%s4172_s0 + $0x68] ss:$16 sps:$4 sm:$0xff]   ;;  %v4026_v13 = vrot.slane %v3523_v6, %v3964_v55 }
  0x3f   :  { %1831 = vmatpush2.bf16.msra.mxu0 %v3371_v34  ;;  %v3998_v18 = vpack.c.bf16 %v193_v12, %v121_v9  ;;  %v4001_v21 = vpack.c.bf16 %v195_v19, %v123_v16  ;;  %v3409_v24 = vld [vmem:[#allocation3 + $0x104] ss:$16 sps:$4 sm:$0xff]   ;;  %v3413_v26 = vld [vmem:[#allocation3 + $0x100] ss:$16 sps:$4 sm:$0xff]   ;;  %v4004_v34 = vpack.c.bf16 %v192_v29, %v120_v28  ;;  %v3531_v12 = vld [vmem:[%s4172_s0 + $0xc] ss:$16 sps:$4 sm:$0xff]  }
  0x40   :  { %1874 = vmatpush2.bf16.msra.mxu1 %v3372_v35  ;;  %1832 = vmatprep.subr.bf16.mxu0 %v3373_v36  ;;  %v3411_v25 = vld [vmem:[#allocation3 + $0x304] ss:$16 sps:$4 sm:$0xff]   ;;  %v3414_v27 = vld [vmem:[#allocation3 + $0x300] ss:$16 sps:$4 sm:$0xff]   ;;  %v4006_v35 = vpack.c.bf16 %v194_v31, %v122_v30  ;;  %v3533_v16 = vld [vmem:[%s4172_s0 + $0x4c] ss:$16 sps:$4 sm:$0xff]  }
  0x41   :  { %1875 = vmatprep.subr.bf16.mxu1 %v3375_v37  ;;  %1846 = vmatprep.mubr.bf16.mxu0 %v3998_v18  ;;  %v3429_v32 = vld [vmem:[#allocation3 + $0x4e4] ss:$16 sps:$4 sm:$0xff]   ;;  %v3427_v36 = vld [vmem:[#allocation3 + $0x4e0] ss:$16 sps:$4 sm:$0xff]  }
  0x42   :  { %1889 = vmatprep.mubr.bf16.mxu1 %v4001_v21  ;;  %v3432_v33 = vld [vmem:[#allocation3 + $0x6e4] ss:$16 sps:$4 sm:$0xff]   ;;  %v3430_v37 = vld [vmem:[#allocation3 + $0x6e0] ss:$16 sps:$4 sm:$0xff]  }
  0x43   :  { %1833 = vmatpush2.bf16.msra.mxu0 %v3377_v38  ;;  %v3435_v38 = vld [vmem:[#allocation3 + $0x4c4] ss:$16 sps:$4 sm:$0xff]   ;;  %v3433_v40 = vld [vmem:[#allocation3 + $0x4c0] ss:$16 sps:$4 sm:$0xff]  }
  0x44   :  { %1876 = vmatpush2.bf16.msra.mxu1 %v3378_v42  ;;  %1834 = vmatprep.subr.bf16.mxu0 %v3379_v43  ;;  %v3438_v39 = vld [vmem:[#allocation3 + $0x6c4] ss:$16 sps:$4 sm:$0xff]   ;;  %v3436_v41 = vld [vmem:[#allocation3 + $0x6c0] ss:$16 sps:$4 sm:$0xff]  }
  0x45   :  { %1877 = vmatprep.subr.bf16.mxu1 %v3381_v44  ;;  %v3441_v42 = vld [vmem:[#allocation3 + $0x4a4] ss:$16 sps:$4 sm:$0xff]   ;;  %v3439_v44 = vld [vmem:[#allocation3 + $0x4a0] ss:$16 sps:$4 sm:$0xff]  }
  0x46   :  { %v3444_v43 = vld [vmem:[#allocation3 + $0x6a4] ss:$16 sps:$4 sm:$0xff]   ;;  %v3463_v62 = vld [vmem:[#allocation3 + $0x420] ss:$16 sps:$4 sm:$0xff]  }
  0x47   :  { %1835 = vmatpush2.bf16.msra.mxu0 %v3383_v45  ;;  %v3442_v45 = vld [vmem:[#allocation3 + $0x6a0] ss:$16 sps:$4 sm:$0xff]   ;;  %v3450_v47 = vld [vmem:[#allocation3 + $0x684] ss:$16 sps:$4 sm:$0xff]  }
  0x48   :  { %1878 = vmatpush2.bf16.msra.mxu1 %v3384_v46  ;;  %1836 = vmatprep.subr.bf16.mxu0 %v3385_v49  ;;  %v3447_v46 = vld [vmem:[#allocation3 + $0x484] ss:$16 sps:$4 sm:$0xff]   ;;  %v3445_v49 = vld [vmem:[#allocation3 + $0x480] ss:$16 sps:$4 sm:$0xff]  }
  0x49   :  { %1879 = vmatprep.subr.bf16.mxu1 %v3387_v50  ;;  %v3448_v50 = vld [vmem:[#allocation3 + $0x680] ss:$16 sps:$4 sm:$0xff]   ;;  %v3459_v56 = vld [vmem:[#allocation3 + $0x444] ss:$16 sps:$4 sm:$0xff]  }
  0x4a   :  { %v3462_v57 = vld [vmem:[#allocation3 + $0x644] ss:$16 sps:$4 sm:$0xff]   ;;  %v3466_v63 = vld [vmem:[#allocation3 + $0x620] ss:$16 sps:$4 sm:$0xff]  }
  0x4b   :  { %1837 = vmatpush2.bf16.msra.mxu0 %v3389_v51  ;;  %v3453_v51 = vld [vmem:[#allocation3 + $0x464] ss:$16 sps:$4 sm:$0xff]   ;;  %v3469_v2 = vld [vmem:[#allocation3 + $0x400] ss:$16 sps:$4 sm:$0xff]  }
  0x4c   :  { %1880 = vmatpush2.bf16.msra.mxu1 %v3390_v52  ;;  %1838 = vmatprep.subr.bf16.mxu0 %v3391_v53  ;;  %v3456_v52 = vld [vmem:[#allocation3 + $0x664] ss:$16 sps:$4 sm:$0xff]   ;;  %v3451_v53 = vld [vmem:[#allocation3 + $0x460] ss:$16 sps:$4 sm:$0xff]  }
  0x4d   :  { %1881 = vmatprep.subr.bf16.mxu1 %v3393_v54  ;;  %v3454_v54 = vld [vmem:[#allocation3 + $0x660] ss:$16 sps:$4 sm:$0xff]   ;;  %v3465_v60 = vld [vmem:[#allocation3 + $0x424] ss:$16 sps:$4 sm:$0xff]  }
  0x4e   :  { %v3468_v61 = vld [vmem:[#allocation3 + $0x624] ss:$16 sps:$4 sm:$0xff]   ;;  %v3472_v3 = vld [vmem:[#allocation3 + $0x600] ss:$16 sps:$4 sm:$0xff]  }
  0x4f   :  { %1839 = vmatpush2.bf16.msra.mxu0 %v3395_v58  ;;  %v3457_v58 = vld [vmem:[#allocation3 + $0x440] ss:$16 sps:$4 sm:$0xff]   ;;  %v3471_v0 = vld [vmem:[#allocation3 + $0x404] ss:$16 sps:$4 sm:$0xff]  }
  0x50   :  { %1882 = vmatpush2.bf16.msra.mxu1 %v3396_v59  ;;  %1840 = vmatprep.subr.bf16.mxu0 %v3397_v4  ;;  %v3460_v59 = vld [vmem:[#allocation3 + $0x640] ss:$16 sps:$4 sm:$0xff]   ;;  %v3474_v1 = vld [vmem:[#allocation3 + $0x604] ss:$16 sps:$4 sm:$0xff]  }
  0x51   :  { %1883 = vmatprep.subr.bf16.mxu1 %v3399_v8  ;;  %v3477_v4 = vld [vmem:[#allocation3 + $0x5e4] ss:$16 sps:$4 sm:$0xff]   ;;  %v3475_v8 = vld [vmem:[#allocation3 + $0x5e0] ss:$16 sps:$4 sm:$0xff]  }
  0x52   :  { %v3480_v5 = vld [vmem:[#allocation3 + $0x7e4] ss:$16 sps:$4 sm:$0xff]   ;;  %v3478_v9 = vld [vmem:[#allocation3 + $0x7e0] ss:$16 sps:$4 sm:$0xff]  }
  0x53   :  { %1841 = vmatpush2.bf16.msra.mxu0 %v3401_v14  ;;  %v4029_v14 = vrot.slane %v3525_v7, %v3964_v55  ;;  %v3483_v19 = vld [vmem:[#allocation3 + $0x5c4] ss:$16 sps:$4 sm:$0xff]   ;;  %v3481_v30 = vld [vmem:[#allocation3 + $0x5c0] ss:$16 sps:$4 sm:$0xff]   ;;  %v3535_v7 = vld [vmem:[#allocation3 + $0xe8] ss:$16 sps:$4 sm:$0xff]  }
  0x54   :  { %1884 = vmatpush2.bf16.msra.mxu1 %v3402_v15  ;;  %1842 = vmatprep.subr.bf16.mxu0 %v3403_v17  ;;  %v3532_v15 = vld [vmem:[%s4172_s0 + $0x2c] ss:$16 sps:$4 sm:$0xff]   ;;  %v3484_v31 = vld [vmem:[#allocation3 + $0x7c0] ss:$16 sps:$4 sm:$0xff]  }
  0x55   :  { %1885 = vmatprep.subr.bf16.mxu1 %v3405_v20  ;;  %v3534_v17 = vld [vmem:[%s4172_s0 + $0x6c] ss:$16 sps:$4 sm:$0xff]   ;;  %v4041_v20 = vrot.slane %v3527_v10, %v3964_v55 }
  0x56   :  { %v4060_v29 = vrot.slane %v3534_v17, %v3964_v55  ;;  %v3546_v10 = vld [vmem:[#allocation3 + $0x2cc] ss:$16 sps:$4 sm:$0xff]  }
  0x57   :  { %1843 = vmatpush2.bf16.msra.mxu0 %v3407_v22  ;;  %v4044_v22 = vrot.slane %v3529_v11, %v3964_v55  ;;  %v3541_v11 = vld [vmem:[#allocation3 + $0xc8] ss:$16 sps:$4 sm:$0xff]   ;;  %v3555_v17 = vld [vmem:[#allocation3 + $0x8c] ss:$16 sps:$4 sm:$0xff]  }
  0x58   :  { %1886 = vmatpush2.bf16.msra.mxu1 %v3408_v23  ;;  %1844 = vmatprep.subr.bf16.mxu0 %v3409_v24  ;;  %v4047_v23 = vrot.slane %v3531_v12, %v3964_v55  ;;  %v3486_v24 = vld [vmem:[#allocation3 + $0x7c4] ss:$16 sps:$4 sm:$0xff]   ;;  %v3544_v12 = vld [vmem:[#allocation3 + $0x2c8] ss:$16 sps:$4 sm:$0xff]  }
  0x59   :  { %1887 = vmatprep.subr.bf16.mxu1 %v3411_v25  ;;  %v157_v25 = vcombine.high %v4026_v13, %v4029_v14  ;;  %v229_v28 = vcombine.high %v4041_v20, %v4044_v22 }
  0x5b   :  { %1845 = vmatpush2.bf16.msra.mxu0 %v3413_v26  ;;  %v4052_v26 = vrot.slane %v3532_v15, %v3964_v55  ;;  %v3547_v15 = vld [vmem:[#allocation3 + $0xa8] ss:$16 sps:$4 sm:$0xff]  }
  0x5c   :  { %1888 = vmatpush2.bf16.msra.mxu1 %v3414_v27  ;;  %1900 = vmatprep.subr.bf16.mxu0 %v3429_v32  ;;  %v4055_v27 = vrot.slane %v3533_v16, %v3964_v55  ;;  %v3550_v16 = vld [vmem:[#allocation3 + $0x2a8] ss:$16 sps:$4 sm:$0xff]  }
  0x5d   :  { %1943 = vmatprep.subr.bf16.mxu1 %v3432_v33  ;;  %v159_v32 = vcombine.high %v4047_v23, %v4052_v26  ;;  %v3489_v33 = vld [vmem:[#allocation3 + $0x5a4] ss:$16 sps:$4 sm:$0xff]  }
  0x5e   :  { %1847 = vmatmul.mubr.bf16.vlgmr.msra.gmra.mxu0 %v4004_v34 }
  0x5f   :  { %1890 = vmatmul.mubr.bf16.vlgmr.msra.gmra.mxu1 %v4006_v35  ;;  %1901 = vmatpush1.bf16.msra.mxu0 %v3427_v36  ;;  %v4064_v36 = vpack.c.bf16 %v229_v28, %v157_v25  ;;  %v3559_v25 = vld [vmem:[#allocation3 + $0x68] ss:$16 sps:$4 sm:$0xff]  }
  0x60   :  { %1944 = vmatpush1.bf16.msra.mxu1 %v3430_v37  ;;  %1902 = vmatprep.subr.bf16.mxu0 %v3435_v38  ;;  %v231_v37 = vcombine.high %v4055_v27, %v4060_v29  ;;  %v3492_v38 = vld [vmem:[#allocation3 + $0x7a4] ss:$16 sps:$4 sm:$0xff]   ;;  %v3568_v28 = vld [vmem:[#allocation3 + $0x248] ss:$16 sps:$4 sm:$0xff]  }
  0x61   :  { %1945 = vmatprep.subr.bf16.mxu1 %v3438_v39  ;;  %1932 = vmatprep.mubr.bf16.mxu0 %v4064_v36  ;;  %v3487_v39 = vld [vmem:[#allocation3 + $0x5a0] ss:$16 sps:$4 sm:$0xff]  }
  0x62   :  { %v4069_v55 = vpack.c.bf16 %v231_v37, %v159_v32  ;;  %v3574_v32 = vld [vmem:[#allocation3 + $0x228] ss:$16 sps:$4 sm:$0xff]   ;;  %v3582_v37 = vld [vmem:[#allocation3 + $0x20c] ss:$16 sps:$4 sm:$0xff]  }
  0x63   :  { %1903 = vmatpush1.bf16.msra.mxu0 %v3433_v40  ;;  %v3490_v40 = vld [vmem:[#allocation3 + $0x7a0] ss:$16 sps:$4 sm:$0xff]  }
  0x64   :  { %1946 = vmatpush1.bf16.msra.mxu1 %v3436_v41  ;;  %1904 = vmatprep.subr.bf16.mxu0 %v3441_v42  ;;  %v3495_v41 = vld [vmem:[#allocation3 + $0x584] ss:$16 sps:$4 sm:$0xff]  }
  0x65   :  { %1947 = vmatprep.subr.bf16.mxu1 %v3444_v43  ;;  %v3498_v42 = vld [vmem:[#allocation3 + $0x784] ss:$16 sps:$4 sm:$0xff]   ;;  %1975 = vmatprep.mubr.bf16.mxu1 %v4069_v55  ;;  %v3493_v43 = vld [vmem:[#allocation3 + $0x580] ss:$16 sps:$4 sm:$0xff]  }
  0x67   :  { %1905 = vmatpush1.bf16.msra.mxu0 %v3439_v44  ;;  %v3496_v44 = vld [vmem:[#allocation3 + $0x780] ss:$16 sps:$4 sm:$0xff]  }
  0x68   :  { %1948 = vmatpush1.bf16.msra.mxu1 %v3442_v45  ;;  %1906 = vmatprep.subr.bf16.mxu0 %v3447_v46  ;;  %v3501_v45 = vld [vmem:[#allocation3 + $0x564] ss:$16 sps:$4 sm:$0xff]  }
  0x69   :  { %1949 = vmatprep.subr.bf16.mxu1 %v3450_v47  ;;  %v3504_v46 = vld [vmem:[#allocation3 + $0x764] ss:$16 sps:$4 sm:$0xff]   ;;  %v3499_v47 = vld [vmem:[#allocation3 + $0x560] ss:$16 sps:$4 sm:$0xff]  }
  0x6b   :  { %1907 = vmatpush1.bf16.msra.mxu0 %v3445_v49  ;;  %v3502_v49 = vld [vmem:[#allocation3 + $0x760] ss:$16 sps:$4 sm:$0xff]  }
  0x6c   :  { %1950 = vmatpush1.bf16.msra.mxu1 %v3448_v50  ;;  %1908 = vmatprep.subr.bf16.mxu0 %v3453_v51  ;;  %v3507_v50 = vld [vmem:[#allocation3 + $0x544] ss:$16 sps:$4 sm:$0xff]  }
  0x6d   :  { %1951 = vmatprep.subr.bf16.mxu1 %v3456_v52  ;;  %v3510_v51 = vld [vmem:[#allocation3 + $0x744] ss:$16 sps:$4 sm:$0xff]   ;;  %v3505_v52 = vld [vmem:[#allocation3 + $0x540] ss:$16 sps:$4 sm:$0xff]  }
  0x6f   :  { %1909 = vmatpush1.bf16.msra.mxu0 %v3451_v53  ;;  %v3508_v53 = vld [vmem:[#allocation3 + $0x740] ss:$16 sps:$4 sm:$0xff]  }
  0x70   :  { %1952 = vmatpush1.bf16.msra.mxu1 %v3454_v54  ;;  %1910 = vmatprep.subr.bf16.mxu0 %v3459_v56  ;;  %v3513_v54 = vld [vmem:[#allocation3 + $0x524] ss:$16 sps:$4 sm:$0xff]  }
  0x71   :  { %1953 = vmatprep.subr.bf16.mxu1 %v3462_v57  ;;  %v3516_v56 = vld [vmem:[#allocation3 + $0x724] ss:$16 sps:$4 sm:$0xff]   ;;  %v3511_v57 = vld [vmem:[#allocation3 + $0x520] ss:$16 sps:$4 sm:$0xff]  }
  0x73   :  { %1911 = vmatpush1.bf16.msra.mxu0 %v3457_v58  ;;  %v3514_v58 = vld [vmem:[#allocation3 + $0x720] ss:$16 sps:$4 sm:$0xff]  }
  0x74   :  { %1954 = vmatpush1.bf16.msra.mxu1 %v3460_v59  ;;  %1912 = vmatprep.subr.bf16.mxu0 %v3465_v60  ;;  %v3519_v59 = vld [vmem:[#allocation3 + $0x504] ss:$16 sps:$4 sm:$0xff]  }
  0x75   :  { %1955 = vmatprep.subr.bf16.mxu1 %v3468_v61  ;;  %v3522_v60 = vld [vmem:[#allocation3 + $0x704] ss:$16 sps:$4 sm:$0xff]   ;;  %v3517_v61 = vld [vmem:[#allocation3 + $0x500] ss:$16 sps:$4 sm:$0xff]  }
  0x77   :  { %1913 = vmatpush1.bf16.msra.mxu0 %v3463_v62  ;;  %v3520_v62 = vld [vmem:[#allocation3 + $0x700] ss:$16 sps:$4 sm:$0xff]  }
  0x78   :  { %1956 = vmatpush1.bf16.msra.mxu1 %v3466_v63  ;;  %1914 = vmatprep.subr.bf16.mxu0 %v3471_v0  ;;  %v156_v63 = vcombine.low %v4026_v13, %v4029_v14  ;;  %v228_v0 = vcombine.low %v4041_v20, %v4044_v22  ;;  %v3549_v13 = vld [vmem:[#allocation3 + $0xac] ss:$16 sps:$4 sm:$0xff]   ;;  %v3553_v20 = vld [vmem:[#allocation3 + $0x88] ss:$16 sps:$4 sm:$0xff]  }
  0x79   :  { %1957 = vmatprep.subr.bf16.mxu1 %v3474_v1  ;;  %v158_v1 = vcombine.low %v4047_v23, %v4052_v26  ;;  %v3552_v14 = vld [vmem:[#allocation3 + $0x2ac] ss:$16 sps:$4 sm:$0xff]   ;;  %v3556_v22 = vld [vmem:[#allocation3 + $0x288] ss:$16 sps:$4 sm:$0xff]  }
  0x7a   :  { %v3561_v23 = vld [vmem:[#allocation3 + $0x6c] ss:$16 sps:$4 sm:$0xff]  }
  0x7b   :  { %1915 = vmatpush1.bf16.msra.mxu0 %v3469_v2  ;;  %v230_v2 = vcombine.low %v4055_v27, %v4060_v29  ;;  %v3570_v26 = vld [vmem:[#allocation3 + $0x24c] ss:$16 sps:$4 sm:$0xff]   ;;  %v3565_v27 = vld [vmem:[#allocation3 + $0x48] ss:$16 sps:$4 sm:$0xff]  }
  0x7c   :  { %1958 = vmatpush1.bf16.msra.mxu1 %v3472_v3  ;;  %1916 = vmatprep.subr.bf16.mxu0 %v3477_v4  ;;  %v3537_v3 = vld [vmem:[#allocation3 + $0xec] ss:$16 sps:$4 sm:$0xff]  }
  0x7d   :  { %1959 = vmatprep.subr.bf16.mxu1 %v3480_v5  ;;  %v3540_v4 = vld [vmem:[#allocation3 + $0x2ec] ss:$16 sps:$4 sm:$0xff]   ;;  %v4080_v5 = vpack.c.bf16 %v228_v0, %v156_v63  ;;  %v4082_v6 = vpack.c.bf16 %v230_v2, %v158_v1  ;;  %v3613_v0 = vld [vmem:[#allocation3 + $0x148] ss:$16 sps:$4 sm:$0xff]  }
  0x7e   :  { %v3573_v29 = vld [vmem:[#allocation3 + $0x2c] ss:$16 sps:$4 sm:$0xff]   ;;  %v3616_v1 = vld [vmem:[#allocation3 + $0x348] ss:$16 sps:$4 sm:$0xff]  }
  0x7f   :  { %1917 = vmatpush2.bf16.msra.mxu0 %v3475_v8  ;;  %v3538_v8 = vld [vmem:[#allocation3 + $0x2e8] ss:$16 sps:$4 sm:$0xff]   ;;  %v3618_v63 = vld [vmem:[#allocation3 + $0x34c] ss:$16 sps:$4 sm:$0xff]  }
  0x80   :  { %1960 = vmatpush2.bf16.msra.mxu1 %v3478_v9  ;;  %1918 = vmatprep.subr.bf16.mxu0 %v3483_v19  ;;  %v3543_v9 = vld [vmem:[#allocation3 + $0xcc] ss:$16 sps:$4 sm:$0xff]  }
  0x81   :  { %1961 = vmatprep.subr.bf16.mxu1 %v3486_v24  ;;  %v3558_v19 = vld [vmem:[#allocation3 + $0x28c] ss:$16 sps:$4 sm:$0xff]  }
  0x82   :  { %v3564_v24 = vld [vmem:[#allocation3 + $0x26c] ss:$16 sps:$4 sm:$0xff]  }
  0x83   :  { %1919 = vmatpush2.bf16.msra.mxu0 %v3481_v30  ;;  %v3576_v30 = vld [vmem:[#allocation3 + $0x22c] ss:$16 sps:$4 sm:$0xff]  }
  0x84   :  { %1962 = vmatpush2.bf16.msra.mxu1 %v3484_v31  ;;  %1920 = vmatprep.subr.bf16.mxu0 %v3489_v33  ;;  %v3571_v31 = vld [vmem:[#allocation3 + $0x28] ss:$16 sps:$4 sm:$0xff]   ;;  %v3579_v33 = vld [vmem:[#allocation3 + $0xc] ss:$16 sps:$4 sm:$0xff]  }
  0x85   :  { %1963 = vmatprep.subr.bf16.mxu1 %v3492_v38  ;;  %v3577_v38 = vld [vmem:[#allocation3 + $0x8] ss:$16 sps:$4 sm:$0xff]   ;;  %v3621_v2 = vld [vmem:[#allocation3 + $0x12c] ss:$16 sps:$4 sm:$0xff]  }
  0x87   :  { %1921 = vmatpush2.bf16.msra.mxu0 %v3487_v39  ;;  %v3580_v39 = vld [vmem:[#allocation3 + $0x208] ss:$16 sps:$4 sm:$0xff]  }
  0x88   :  { %1964 = vmatpush2.bf16.msra.mxu1 %v3490_v40  ;;  %1922 = vmatprep.subr.bf16.mxu0 %v3495_v41  ;;  %v3585_v40 = vld [vmem:[#allocation3 + $0x1ec] ss:$16 sps:$4 sm:$0xff]  }
  0x89   :  { %1965 = vmatprep.subr.bf16.mxu1 %v3498_v42  ;;  %v3588_v41 = vld [vmem:[#allocation3 + $0x3ec] ss:$16 sps:$4 sm:$0xff]   ;;  %v3583_v42 = vld [vmem:[#allocation3 + $0x1e8] ss:$16 sps:$4 sm:$0xff]  }
  0x8b   :  { %1923 = vmatpush2.bf16.msra.mxu0 %v3493_v43  ;;  %v3586_v43 = vld [vmem:[#allocation3 + $0x3e8] ss:$16 sps:$4 sm:$0xff]  }
  0x8c   :  { %1966 = vmatpush2.bf16.msra.mxu1 %v3496_v44  ;;  %1924 = vmatprep.subr.bf16.mxu0 %v3501_v45  ;;  %v3591_v44 = vld [vmem:[#allocation3 + $0x1cc] ss:$16 sps:$4 sm:$0xff]  }
  0x8d   :  { %1967 = vmatprep.subr.bf16.mxu1 %v3504_v46  ;;  %v3594_v45 = vld [vmem:[#allocation3 + $0x3cc] ss:$16 sps:$4 sm:$0xff]   ;;  %v3589_v46 = vld [vmem:[#allocation3 + $0x1c8] ss:$16 sps:$4 sm:$0xff]  }
  0x8f   :  { %1925 = vmatpush2.bf16.msra.mxu0 %v3499_v47  ;;  %v3592_v47 = vld [vmem:[#allocation3 + $0x3c8] ss:$16 sps:$4 sm:$0xff]  }
  0x90   :  { %1968 = vmatpush2.bf16.msra.mxu1 %v3502_v49  ;;  %1926 = vmatprep.subr.bf16.mxu0 %v3507_v50  ;;  %v3597_v49 = vld [vmem:[#allocation3 + $0x1ac] ss:$16 sps:$4 sm:$0xff]  }
  0x91   :  { %1969 = vmatprep.subr.bf16.mxu1 %v3510_v51  ;;  %v3600_v50 = vld [vmem:[#allocation3 + $0x3ac] ss:$16 sps:$4 sm:$0xff]   ;;  %v3595_v51 = vld [vmem:[#allocation3 + $0x1a8] ss:$16 sps:$4 sm:$0xff]  }
  0x93   :  { %1927 = vmatpush2.bf16.msra.mxu0 %v3505_v52  ;;  %v3598_v52 = vld [vmem:[#allocation3 + $0x3a8] ss:$16 sps:$4 sm:$0xff]  }
  0x94   :  { %1970 = vmatpush2.bf16.msra.mxu1 %v3508_v53  ;;  %1928 = vmatprep.subr.bf16.mxu0 %v3513_v54  ;;  %v3603_v53 = vld [vmem:[#allocation3 + $0x18c] ss:$16 sps:$4 sm:$0xff]  }
  0x95   :  { %1971 = vmatprep.subr.bf16.mxu1 %v3516_v56  ;;  %v3606_v54 = vld [vmem:[#allocation3 + $0x38c] ss:$16 sps:$4 sm:$0xff]   ;;  %v3601_v56 = vld [vmem:[#allocation3 + $0x188] ss:$16 sps:$4 sm:$0xff]  }
  0x97   :  { %1929 = vmatpush2.bf16.msra.mxu0 %v3511_v57  ;;  %v3604_v57 = vld [vmem:[#allocation3 + $0x388] ss:$16 sps:$4 sm:$0xff]  }
  0x98   :  { %1972 = vmatpush2.bf16.msra.mxu1 %v3514_v58  ;;  %1930 = vmatprep.subr.bf16.mxu0 %v3519_v59  ;;  %v3609_v58 = vld [vmem:[#allocation3 + $0x16c] ss:$16 sps:$4 sm:$0xff]  }
  0x99   :  { %1973 = vmatprep.subr.bf16.mxu1 %v3522_v60  ;;  %v3612_v59 = vld [vmem:[#allocation3 + $0x36c] ss:$16 sps:$4 sm:$0xff]   ;;  %v3607_v60 = vld [vmem:[#allocation3 + $0x168] ss:$16 sps:$4 sm:$0xff]  }
  0x9b   :  { %1931 = vmatpush2.bf16.msra.mxu0 %v3517_v61  ;;  %v3610_v61 = vld [vmem:[#allocation3 + $0x368] ss:$16 sps:$4 sm:$0xff]  }
  0x9c   :  { %1974 = vmatpush2.bf16.msra.mxu1 %v3520_v62  ;;  %1986 = vmatprep.subr.bf16.mxu0 %v3537_v3  ;;  %v3615_v62 = vld [vmem:[#allocation3 + $0x14c] ss:$16 sps:$4 sm:$0xff]  }
  0x9d   :  { %2029 = vmatprep.subr.bf16.mxu1 %v3540_v4  ;;  %v3624_v3 = vld [vmem:[#allocation3 + $0x32c] ss:$16 sps:$4 sm:$0xff]   ;;  %v3619_v4 = vld [vmem:[#allocation3 + $0x128] ss:$16 sps:$4 sm:$0xff]  }
  0x9e   :  { %1933 = vmatmul.mubr.bf16.vlgmr.msra.gmra.mxu0 %v4080_v5 }
  0x9f   :  { %1976 = vmatmul.mubr.bf16.vlgmr.msra.gmra.mxu1 %v4082_v6  ;;  %1987 = vmatpush1.bf16.msra.mxu0 %v3535_v7  ;;  %v3622_v7 = vld [vmem:[#allocation3 + $0x328] ss:$16 sps:$4 sm:$0xff]  }
  0xa0   :  { %2030 = vmatpush1.bf16.msra.mxu1 %v3538_v8  ;;  %1988 = vmatprep.subr.bf16.mxu0 %v3543_v9  ;;  %v3627_v8 = vld [vmem:[#allocation3 + $0x10c] ss:$16 sps:$4 sm:$0xff]  }
  0xa1   :  { %2031 = vmatprep.subr.bf16.mxu1 %v3546_v10  ;;  %2018 = vmatprep.mubr.bf16.mxu0 %v3998_v18  ;;  %v3562_v18 = vld [vmem:[#allocation3 + $0x268] ss:$16 sps:$4 sm:$0xff]   ;;  %v3630_v9 = vld [vmem:[#allocation3 + $0x30c] ss:$16 sps:$4 sm:$0xff]  }
  0xa2   :  { %2061 = vmatprep.mubr.bf16.mxu1 %v4001_v21  ;;  %v3567_v21 = vld [vmem:[#allocation3 + $0x4c] ss:$16 sps:$4 sm:$0xff]   ;;  %v3625_v10 = vld [vmem:[#allocation3 + $0x108] ss:$16 sps:$4 sm:$0xff]  }
  0xa3   :  { %1989 = vmatpush1.bf16.msra.mxu0 %v3541_v11  ;;  %v3628_v11 = vld [vmem:[#allocation3 + $0x308] ss:$16 sps:$4 sm:$0xff]  }
  0xa4   :  { %2032 = vmatpush1.bf16.msra.mxu1 %v3544_v12  ;;  %1990 = vmatprep.subr.bf16.mxu0 %v3549_v13  ;;  %v3633_v12 = vld [vmem:[#allocation3 + $0x4ec] ss:$16 sps:$4 sm:$0xff]  }
  0xa5   :  { %2033 = vmatprep.subr.bf16.mxu1 %v3552_v14  ;;  %v3636_v13 = vld [vmem:[#allocation3 + $0x6ec] ss:$16 sps:$4 sm:$0xff]   ;;  %v3631_v14 = vld [vmem:[#allocation3 + $0x4e8] ss:$16 sps:$4 sm:$0xff]  }
  0xa7   :  { %1991 = vmatpush1.bf16.msra.mxu0 %v3547_v15  ;;  %v3634_v15 = vld [vmem:[#allocation3 + $0x6e8] ss:$16 sps:$4 sm:$0xff]  }
  0xa8   :  { %2034 = vmatpush1.bf16.msra.mxu1 %v3550_v16  ;;  %1992 = vmatprep.subr.bf16.mxu0 %v3555_v17  ;;  %v3639_v16 = vld [vmem:[#allocation3 + $0x4cc] ss:$16 sps:$4 sm:$0xff]  }
  0xa9   :  { %2035 = vmatprep.subr.bf16.mxu1 %v3558_v19  ;;  %v3642_v17 = vld [vmem:[#allocation3 + $0x6cc] ss:$16 sps:$4 sm:$0xff]   ;;  %v3637_v19 = vld [vmem:[#allocation3 + $0x4c8] ss:$16 sps:$4 sm:$0xff]  }
  0xab   :  { %1993 = vmatpush1.bf16.msra.mxu0 %v3553_v20  ;;  %v3640_v20 = vld [vmem:[#allocation3 + $0x6c8] ss:$16 sps:$4 sm:$0xff]  }
  0xac   :  { %2036 = vmatpush1.bf16.msra.mxu1 %v3556_v22  ;;  %1994 = vmatprep.subr.bf16.mxu0 %v3561_v23  ;;  %v3645_v22 = vld [vmem:[#allocation3 + $0x4ac] ss:$16 sps:$4 sm:$0xff]  }
  0xad   :  { %2037 = vmatprep.subr.bf16.mxu1 %v3564_v24  ;;  %v3648_v23 = vld [vmem:[#allocation3 + $0x6ac] ss:$16 sps:$4 sm:$0xff]   ;;  %v3643_v24 = vld [vmem:[#allocation3 + $0x4a8] ss:$16 sps:$4 sm:$0xff]  }
  0xaf   :  { %1995 = vmatpush1.bf16.msra.mxu0 %v3559_v25  ;;  %v3646_v25 = vld [vmem:[#allocation3 + $0x6a8] ss:$16 sps:$4 sm:$0xff]  }
  0xb0   :  { %2038 = vmatpush1.bf16.msra.mxu1 %v3562_v18  ;;  %1996 = vmatprep.subr.bf16.mxu0 %v3567_v21  ;;  %v3651_v18 = vld [vmem:[#allocation3 + $0x48c] ss:$16 sps:$4 sm:$0xff]   ;;  %v3652_v21 = vld [vmem:[#allocation3 + $0x688] ss:$16 sps:$4 sm:$0xff]  }
  0xb1   :  { %2039 = vmatprep.subr.bf16.mxu1 %v3570_v26  ;;  %v3657_v26 = vld [vmem:[#allocation3 + $0x46c] ss:$16 sps:$4 sm:$0xff]  }
  0xb3   :  { %1997 = vmatpush1.bf16.msra.mxu0 %v3565_v27  ;;  %v3660_v27 = vld [vmem:[#allocation3 + $0x66c] ss:$16 sps:$4 sm:$0xff]  }
  0xb4   :  { %2040 = vmatpush1.bf16.msra.mxu1 %v3568_v28  ;;  %1998 = vmatprep.subr.bf16.mxu0 %v3573_v29  ;;  %v3655_v28 = vld [vmem:[#allocation3 + $0x468] ss:$16 sps:$4 sm:$0xff]  }
  0xb5   :  { %2041 = vmatprep.subr.bf16.mxu1 %v3576_v30  ;;  %v3658_v29 = vld [vmem:[#allocation3 + $0x668] ss:$16 sps:$4 sm:$0xff]   ;;  %v3666_v30 = vld [vmem:[#allocation3 + $0x64c] ss:$16 sps:$4 sm:$0xff]  }
  0xb7   :  { %1999 = vmatpush1.bf16.msra.mxu0 %v3571_v31  ;;  %v3664_v31 = vld [vmem:[#allocation3 + $0x648] ss:$16 sps:$4 sm:$0xff]  }
  0xb8   :  { %2042 = vmatpush1.bf16.msra.mxu1 %v3574_v32  ;;  %2000 = vmatprep.subr.bf16.mxu0 %v3579_v33  ;;  %v3669_v32 = vld [vmem:[#allocation3 + $0x42c] ss:$16 sps:$4 sm:$0xff]  }
  0xb9   :  { %2043 = vmatprep.subr.bf16.mxu1 %v3582_v37  ;;  %v3672_v33 = vld [vmem:[#allocation3 + $0x62c] ss:$16 sps:$4 sm:$0xff]   ;;  %v3667_v37 = vld [vmem:[#allocation3 + $0x428] ss:$16 sps:$4 sm:$0xff]  }
  0xbb   :  { %2001 = vmatpush1.bf16.msra.mxu0 %v3577_v38  ;;  %v3670_v38 = vld [vmem:[#allocation3 + $0x628] ss:$16 sps:$4 sm:$0xff]  }
  0xbc   :  { %2044 = vmatpush1.bf16.msra.mxu1 %v3580_v39  ;;  %2002 = vmatprep.subr.bf16.mxu0 %v3585_v40  ;;  %v3675_v39 = vld [vmem:[#allocation3 + $0x40c] ss:$16 sps:$4 sm:$0xff]  }
  0xbd   :  { %2045 = vmatprep.subr.bf16.mxu1 %v3588_v41  ;;  %v3678_v40 = vld [vmem:[#allocation3 + $0x60c] ss:$16 sps:$4 sm:$0xff]   ;;  %v3673_v41 = vld [vmem:[#allocation3 + $0x408] ss:$16 sps:$4 sm:$0xff]  }
  0xbf   :  { %2003 = vmatpush2.bf16.msra.mxu0 %v3583_v42  ;;  %v3676_v42 = vld [vmem:[#allocation3 + $0x608] ss:$16 sps:$4 sm:$0xff]  }
  0xc0   :  { %2046 = vmatpush2.bf16.msra.mxu1 %v3586_v43  ;;  %2004 = vmatprep.subr.bf16.mxu0 %v3591_v44  ;;  %v3681_v43 = vld [vmem:[#allocation3 + $0x5ec] ss:$16 sps:$4 sm:$0xff]  }
  0xc1   :  { %2047 = vmatprep.subr.bf16.mxu1 %v3594_v45  ;;  %v3684_v44 = vld [vmem:[#allocation3 + $0x7ec] ss:$16 sps:$4 sm:$0xff]   ;;  %v3679_v45 = vld [vmem:[#allocation3 + $0x5e8] ss:$16 sps:$4 sm:$0xff]  }
  0xc3   :  { %2005 = vmatpush2.bf16.msra.mxu0 %v3589_v46  ;;  %v3682_v46 = vld [vmem:[#allocation3 + $0x7e8] ss:$16 sps:$4 sm:$0xff]  }
  0xc4   :  { %2048 = vmatpush2.bf16.msra.mxu1 %v3592_v47  ;;  %2006 = vmatprep.subr.bf16.mxu0 %v3597_v49  ;;  %v3687_v47 = vld [vmem:[#allocation3 + $0x5cc] ss:$16 sps:$4 sm:$0xff]  }
  0xc5   :  { %2049 = vmatprep.subr.bf16.mxu1 %v3600_v50  ;;  %v3690_v49 = vld [vmem:[#allocation3 + $0x7cc] ss:$16 sps:$4 sm:$0xff]   ;;  %v3685_v50 = vld [vmem:[#allocation3 + $0x5c8] ss:$16 sps:$4 sm:$0xff]  }
  0xc7   :  { %2007 = vmatpush2.bf16.msra.mxu0 %v3595_v51  ;;  %v3688_v51 = vld [vmem:[#allocation3 + $0x7c8] ss:$16 sps:$4 sm:$0xff]  }
  0xc8   :  { %2050 = vmatpush2.bf16.msra.mxu1 %v3598_v52  ;;  %2008 = vmatprep.subr.bf16.mxu0 %v3603_v53  ;;  %v3693_v52 = vld [vmem:[#allocation3 + $0x5ac] ss:$16 sps:$4 sm:$0xff]  }
  0xc9   :  { %2051 = vmatprep.subr.bf16.mxu1 %v3606_v54  ;;  %v3696_v53 = vld [vmem:[#allocation3 + $0x7ac] ss:$16 sps:$4 sm:$0xff]   ;;  %v3691_v54 = vld [vmem:[#allocation3 + $0x5a8] ss:$16 sps:$4 sm:$0xff]  }
  0xcb   :  { %2009 = vmatpush2.bf16.msra.mxu0 %v3601_v56  ;;  %v3694_v56 = vld [vmem:[#allocation3 + $0x7a8] ss:$16 sps:$4 sm:$0xff]  }
  0xcc   :  { %2052 = vmatpush2.bf16.msra.mxu1 %v3604_v57  ;;  %2010 = vmatprep.subr.bf16.mxu0 %v3609_v58  ;;  %v3699_v57 = vld [vmem:[#allocation3 + $0x58c] ss:$16 sps:$4 sm:$0xff]  }
  0xcd   :  { %2053 = vmatprep.subr.bf16.mxu1 %v3612_v59  ;;  %v3702_v58 = vld [vmem:[#allocation3 + $0x78c] ss:$16 sps:$4 sm:$0xff]   ;;  %v3697_v59 = vld [vmem:[#allocation3 + $0x588] ss:$16 sps:$4 sm:$0xff]  }
  0xcf   :  { %2011 = vmatpush2.bf16.msra.mxu0 %v3607_v60  ;;  %v3700_v60 = vld [vmem:[#allocation3 + $0x788] ss:$16 sps:$4 sm:$0xff]  }
  0xd0   :  { %2054 = vmatpush2.bf16.msra.mxu1 %v3610_v61  ;;  %2012 = vmatprep.subr.bf16.mxu0 %v3615_v62  ;;  %v3705_v61 = vld [vmem:[#allocation3 + $0x56c] ss:$16 sps:$4 sm:$0xff]  }
  0xd1   :  { %2055 = vmatprep.subr.bf16.mxu1 %v3618_v63  ;;  %v3708_v62 = vld [vmem:[#allocation3 + $0x76c] ss:$16 sps:$4 sm:$0xff]   ;;  %v3703_v63 = vld [vmem:[#allocation3 + $0x568] ss:$16 sps:$4 sm:$0xff]  }
  0xd3   :  { %2013 = vmatpush2.bf16.msra.mxu0 %v3613_v0  ;;  %v3706_v0 = vld [vmem:[#allocation3 + $0x768] ss:$16 sps:$4 sm:$0xff]  }
  0xd4   :  { %2056 = vmatpush2.bf16.msra.mxu1 %v3616_v1  ;;  %2014 = vmatprep.subr.bf16.mxu0 %v3621_v2  ;;  %v3711_v1 = vld [vmem:[#allocation3 + $0x54c] ss:$16 sps:$4 sm:$0xff]  }
  0xd5   :  { %2057 = vmatprep.subr.bf16.mxu1 %v3624_v3  ;;  %v3714_v2 = vld [vmem:[#allocation3 + $0x74c] ss:$16 sps:$4 sm:$0xff]   ;;  %v3709_v3 = vld [vmem:[#allocation3 + $0x548] ss:$16 sps:$4 sm:$0xff]  }
  0xd7   :  { %2015 = vmatpush2.bf16.msra.mxu0 %v3619_v4  ;;  %v3712_v4 = vld [vmem:[#allocation3 + $0x748] ss:$16 sps:$4 sm:$0xff]  }
  0xd8   :  { %2058 = vmatpush2.bf16.msra.mxu1 %v3622_v7  ;;  %2016 = vmatprep.subr.bf16.mxu0 %v3627_v8  ;;  %v3717_v7 = vld [vmem:[#allocation3 + $0x52c] ss:$16 sps:$4 sm:$0xff]  }
  0xd9   :  { %2059 = vmatprep.subr.bf16.mxu1 %v3630_v9  ;;  %v3720_v8 = vld [vmem:[#allocation3 + $0x72c] ss:$16 sps:$4 sm:$0xff]   ;;  %v3715_v9 = vld [vmem:[#allocation3 + $0x528] ss:$16 sps:$4 sm:$0xff]  }
  0xdb   :  { %2017 = vmatpush2.bf16.msra.mxu0 %v3625_v10  ;;  %v3718_v10 = vld [vmem:[#allocation3 + $0x728] ss:$16 sps:$4 sm:$0xff]  }
  0xdc   :  { %2060 = vmatpush2.bf16.msra.mxu1 %v3628_v11  ;;  %2072 = vmatprep.subr.bf16.mxu0 %v3633_v12  ;;  %v3723_v11 = vld [vmem:[#allocation3 + $0x50c] ss:$16 sps:$4 sm:$0xff]  }
  0xdd   :  { %2115 = vmatprep.subr.bf16.mxu1 %v3636_v13  ;;  %v3726_v12 = vld [vmem:[#allocation3 + $0x70c] ss:$16 sps:$4 sm:$0xff]   ;;  %v3721_v13 = vld [vmem:[#allocation3 + $0x508] ss:$16 sps:$4 sm:$0xff]  }
  0xde   :  { %2019 = vmatmul.mubr.bf16.vlgmr.msra.gmra.mxu0 %v4004_v34  ;;  %v3654_v34 = vld [vmem:[#allocation3 + $0x68c] ss:$16 sps:$4 sm:$0xff]  }
  0xdf   :  { %2062 = vmatmul.mubr.bf16.vlgmr.msra.gmra.mxu1 %v4006_v35  ;;  %2073 = vmatpush1.bf16.msra.mxu0 %v3631_v14  ;;  %v3649_v35 = vld [vmem:[#allocation3 + $0x488] ss:$16 sps:$4 sm:$0xff]  }
  0xe0   :  { %2116 = vmatpush1.bf16.msra.mxu1 %v3634_v15  ;;  %2074 = vmatprep.subr.bf16.mxu0 %v3639_v16  ;;  %v3724_v14 = vld [vmem:[#allocation3 + $0x708] ss:$16 sps:$4 sm:$0xff]   ;;  %v3729_v15 = vld [vmem:[#allocation6 + $0x74] ss:$8 sps:$4 sm:$0xff]  }
  0xe1   :  { %2117 = vmatprep.subr.bf16.mxu1 %v3642_v17  ;;  %2104 = vmatprep.mubr.bf16.mxu0 %v4064_v36  ;;  %v3663_v36 = vld [vmem:[#allocation3 + $0x44c] ss:$16 sps:$4 sm:$0xff]   ;;  %v3727_v16 = vld [vmem:[#allocation6 + $0x70] ss:$8 sps:$4 sm:$0xff]  }
  0xe2   :  { %2147 = vmatprep.mubr.bf16.mxu1 %v4069_v55  ;;  %v3661_v55 = vld [vmem:[#allocation3 + $0x448] ss:$16 sps:$4 sm:$0xff]   ;;  %v3732_v17 = vld [vmem:[#allocation6 + $0x64] ss:$8 sps:$4 sm:$0xff]  }
  0xe3   :  { %2075 = vmatpush1.bf16.msra.mxu0 %v3637_v19  ;;  %v3730_v19 = vld [vmem:[#allocation6 + $0x60] ss:$8 sps:$4 sm:$0xff]  }
  0xe4   :  { %2118 = vmatpush1.bf16.msra.mxu1 %v3640_v20  ;;  %2076 = vmatprep.subr.bf16.mxu0 %v3645_v22  ;;  %v3735_v20 = vld [vmem:[#allocation6 + $0x54] ss:$8 sps:$4 sm:$0xff]   ;;  %v3733_v22 = vld [vmem:[#allocation6 + $0x50] ss:$8 sps:$4 sm:$0xff]  }
  0xe5   :  { %2119 = vmatprep.subr.bf16.mxu1 %v3648_v23  ;;  %v3738_v23 = vld [vmem:[#allocation6 + $0x44] ss:$8 sps:$4 sm:$0xff]  }
  0xe7   :  { %2077 = vmatpush1.bf16.msra.mxu0 %v3643_v24  ;;  %v3736_v24 = vld [vmem:[#allocation6 + $0x40] ss:$8 sps:$4 sm:$0xff]  }
  0xe8   :  { %2120 = vmatpush1.bf16.msra.mxu1 %v3646_v25  ;;  %2078 = vmatprep.subr.bf16.mxu0 %v3651_v18  ;;  %v3775_v25 = vld [vmem:[#allocation6 + $0x170] ss:$8 sps:$4 sm:$0xff]   ;;  %v3777_v18 = vld [vmem:[#allocation6 + $0x174] ss:$8 sps:$4 sm:$0xff]  }
  0xe9   :  { %2121 = vmatprep.subr.bf16.mxu1 %v3654_v34  ;;  %v3741_v34 = vld [vmem:[#allocation6 + $0x34] ss:$8 sps:$4 sm:$0xff]  }
  0xeb   :  { %2079 = vmatpush1.bf16.msra.mxu0 %v3649_v35  ;;  %v3780_v35 = vld [vmem:[#allocation6 + $0x164] ss:$8 sps:$4 sm:$0xff]  }
  0xec   :  { %2122 = vmatpush1.bf16.msra.mxu1 %v3652_v21  ;;  %2080 = vmatprep.subr.bf16.mxu0 %v3657_v26  ;;  %v3783_v21 = vld [vmem:[#allocation6 + $0x154] ss:$8 sps:$4 sm:$0xff]   ;;  %v3744_v26 = vld [vmem:[#allocation6 + $0x24] ss:$8 sps:$4 sm:$0xff]  }
  0xed   :  { %2123 = vmatprep.subr.bf16.mxu1 %v3660_v27  ;;  %v3781_v27 = vld [vmem:[#allocation6 + $0x150] ss:$8 sps:$4 sm:$0xff]  }
  0xef   :  { %2081 = vmatpush1.bf16.msra.mxu0 %v3655_v28  ;;  %v3742_v28 = vld [vmem:[#allocation6 + $0x20] ss:$8 sps:$4 sm:$0xff]  }
  0xf0   :  { %2124 = vmatpush1.bf16.msra.mxu1 %v3658_v29  ;;  %2082 = vmatprep.subr.bf16.mxu0 %v3663_v36  ;;  %v3786_v29 = vld [vmem:[#allocation6 + $0x144] ss:$8 sps:$4 sm:$0xff]   ;;  %v3747_v36 = vld [vmem:[#allocation6 + $0x14] ss:$8 sps:$4 sm:$0xff]  }
  0xf1   :  { %2125 = vmatprep.subr.bf16.mxu1 %v3666_v30  ;;  %v3784_v30 = vld [vmem:[#allocation6 + $0x140] ss:$8 sps:$4 sm:$0xff]  }
  0xf3   :  { %2083 = vmatpush1.bf16.msra.mxu0 %v3661_v55  ;;  %v3745_v55 = vld [vmem:[#allocation6 + $0x10] ss:$8 sps:$4 sm:$0xff]  }
  0xf4   :  { %2126 = vmatpush1.bf16.msra.mxu1 %v3664_v31  ;;  %2084 = vmatprep.subr.bf16.mxu0 %v3669_v32  ;;  %v3789_v31 = vld [vmem:[#allocation6 + $0x134] ss:$8 sps:$4 sm:$0xff]   ;;  %v3750_v32 = vld [vmem:[#allocation6 + $0x4] ss:$8 sps:$4 sm:$0xff]  }
  0xf5   :  { %2127 = vmatprep.subr.bf16.mxu1 %v3672_v33  ;;  %v3787_v33 = vld [vmem:[#allocation6 + $0x130] ss:$8 sps:$4 sm:$0xff]  }
  0xf7   :  { %2085 = vmatpush1.bf16.msra.mxu0 %v3667_v37  ;;  %v3748_v37 = vld [vmem:[#allocation6] ss:$8 sps:$4 sm:$0xff]  }
  0xf8   :  { %2128 = vmatpush1.bf16.msra.mxu1 %v3670_v38  ;;  %2086 = vmatprep.subr.bf16.mxu0 %v3675_v39  ;;  %v3792_v38 = vld [vmem:[#allocation6 + $0x124] ss:$8 sps:$4 sm:$0xff]   ;;  %v3753_v39 = vld [vmem:[#allocation6 + $0xf4] ss:$8 sps:$4 sm:$0xff]  }
  0xf9   :  { %2129 = vmatprep.subr.bf16.mxu1 %v3678_v40  ;;  %v3790_v40 = vld [vmem:[#allocation6 + $0x120] ss:$8 sps:$4 sm:$0xff]  }
  0xfb   :  { %2087 = vmatpush1.bf16.msra.mxu0 %v3673_v41  ;;  %v3751_v41 = vld [vmem:[#allocation6 + $0xf0] ss:$8 sps:$4 sm:$0xff]  }
  0xfc   :  { %2130 = vmatpush1.bf16.msra.mxu1 %v3676_v42  ;;  %2088 = vmatprep.subr.bf16.mxu0 %v3681_v43  ;;  %v3795_v42 = vld [vmem:[#allocation6 + $0x114] ss:$8 sps:$4 sm:$0xff]   ;;  %v3756_v43 = vld [vmem:[#allocation6 + $0xe4] ss:$8 sps:$4 sm:$0xff]  }
  0xfd   :  { %2131 = vmatprep.subr.bf16.mxu1 %v3684_v44  ;;  %v3793_v44 = vld [vmem:[#allocation6 + $0x110] ss:$8 sps:$4 sm:$0xff]  }
  0xff   :  { %2089 = vmatpush2.bf16.msra.mxu0 %v3679_v45  ;;  %v3754_v45 = vld [vmem:[#allocation6 + $0xe0] ss:$8 sps:$4 sm:$0xff]  }
 0x100   :  { %2132 = vmatpush2.bf16.msra.mxu1 %v3682_v46  ;;  %2090 = vmatprep.subr.bf16.mxu0 %v3687_v47  ;;  %v3798_v46 = vld [vmem:[#allocation6 + $0x104] ss:$8 sps:$4 sm:$0xff]   ;;  %v3759_v47 = vld [vmem:[#allocation6 + $0xd4] ss:$8 sps:$4 sm:$0xff]  }
 0x101   :  { %2133 = vmatprep.subr.bf16.mxu1 %v3690_v49  ;;  %v3796_v49 = vld [vmem:[#allocation6 + $0x100] ss:$8 sps:$4 sm:$0xff]  }
 0x103   :  { %2091 = vmatpush2.bf16.msra.mxu0 %v3685_v50  ;;  %v3757_v50 = vld [vmem:[#allocation6 + $0xd0] ss:$8 sps:$4 sm:$0xff]  }
 0x104   :  { %2134 = vmatpush2.bf16.msra.mxu1 %v3688_v51  ;;  %2092 = vmatprep.subr.bf16.mxu0 %v3693_v52  ;;  %v3801_v51 = vld [vmem:[#allocation6 + $0x1f4] ss:$8 sps:$4 sm:$0xff]   ;;  %v3762_v52 = vld [vmem:[#allocation6 + $0xc4] ss:$8 sps:$4 sm:$0xff]  }
 0x105   :  { %2135 = vmatprep.subr.bf16.mxu1 %v3696_v53  ;;  %v3799_v53 = vld [vmem:[#allocation6 + $0x1f0] ss:$8 sps:$4 sm:$0xff]  }
 0x107   :  { %2093 = vmatpush2.bf16.msra.mxu0 %v3691_v54  ;;  %v3760_v54 = vld [vmem:[#allocation6 + $0xc0] ss:$8 sps:$4 sm:$0xff]  }
 0x108   :  { %2136 = vmatpush2.bf16.msra.mxu1 %v3694_v56  ;;  %2094 = vmatprep.subr.bf16.mxu0 %v3699_v57  ;;  %v3804_v56 = vld [vmem:[#allocation6 + $0x1e4] ss:$8 sps:$4 sm:$0xff]   ;;  %v3765_v57 = vld [vmem:[#allocation6 + $0xb4] ss:$8 sps:$4 sm:$0xff]  }
 0x109   :  { %2137 = vmatprep.subr.bf16.mxu1 %v3702_v58  ;;  %v3802_v58 = vld [vmem:[#allocation6 + $0x1e0] ss:$8 sps:$4 sm:$0xff]  }
 0x10b   :  { %2095 = vmatpush2.bf16.msra.mxu0 %v3697_v59  ;;  %v3763_v59 = vld [vmem:[#allocation6 + $0xb0] ss:$8 sps:$4 sm:$0xff]  }
 0x10c   :  { %2138 = vmatpush2.bf16.msra.mxu1 %v3700_v60  ;;  %2096 = vmatprep.subr.bf16.mxu0 %v3705_v61  ;;  %v3807_v60 = vld [vmem:[#allocation6 + $0x1d4] ss:$8 sps:$4 sm:$0xff]   ;;  %v3768_v61 = vld [vmem:[#allocation6 + $0xa4] ss:$8 sps:$4 sm:$0xff]  }
 0x10d   :  { %2139 = vmatprep.subr.bf16.mxu1 %v3708_v62  ;;  %v3805_v62 = vld [vmem:[#allocation6 + $0x1d0] ss:$8 sps:$4 sm:$0xff]  }
 0x10f   :  { %2097 = vmatpush2.bf16.msra.mxu0 %v3703_v63  ;;  %v3766_v63 = vld [vmem:[#allocation6 + $0xa0] ss:$8 sps:$4 sm:$0xff]  }
 0x110   :  { %2140 = vmatpush2.bf16.msra.mxu1 %v3706_v0  ;;  %2098 = vmatprep.subr.bf16.mxu0 %v3711_v1  ;;  %v3810_v0 = vld [vmem:[#allocation6 + $0x1c4] ss:$8 sps:$4 sm:$0xff]  }
 0x111   :  { %2141 = vmatprep.subr.bf16.mxu1 %v3714_v2 }
 0x113   :  { %2099 = vmatpush2.bf16.msra.mxu0 %v3709_v3  ;;  %v3771_v3 = vld [vmem:[#allocation6 + $0x94] ss:$8 sps:$4 sm:$0xff]  }
 0x114   :  { %2142 = vmatpush2.bf16.msra.mxu1 %v3712_v4  ;;  %2100 = vmatprep.subr.bf16.mxu0 %v3717_v7  ;;  %v3808_v4 = vld [vmem:[#allocation6 + $0x1c0] ss:$8 sps:$4 sm:$0xff]   ;;  %v520_v7 = vsub.s32 1, %v3961_v48 }
 0x115   :  { %2143 = vmatprep.subr.bf16.mxu1 %v3720_v8  ;;  %v3769_v8 = vld [vmem:[#allocation6 + $0x90] ss:$8 sps:$4 sm:$0xff]  }
 0x117   :  { %2101 = vmatpush2.bf16.msra.mxu0 %v3715_v9  ;;  %v4098_v9 = vld [vmem:[%s4174_s2] sm:$0xf] }
 0x118   :  { %2144 = vmatpush2.bf16.msra.mxu1 %v3718_v10  ;;  %2102 = vmatprep.subr.bf16.mxu0 %v3723_v11  ;;  %v516_v10 = vsub.s32 0, %v3961_v48 }
 0x119   :  { %2145 = vmatprep.subr.bf16.mxu1 %v3726_v12 }
 0x11b   :  { %2103 = vmatpush2.bf16.msra.mxu0 %v3721_v13  ;;  %v3774_v13 = vld [vmem:[#allocation6 + $0x84] ss:$8 sps:$4 sm:$0xff]  }
 0x11c   :  { %2146 = vmatpush2.bf16.msra.mxu1 %v3724_v14  ;;  %2614 = vmatprep.subr.bf16.mxu0 %v3729_v15  ;;  %v521_v14 = vrot.slane %v4098_v9, %v520_v7  ;;  %v3772_v15 = vld [vmem:[#allocation6 + $0x80] ss:$8 sps:$4 sm:$0xff]  }
 0x11d   :  { %2657 = vmatprep.subr.bf16.mxu1 %v3777_v18 }
 0x11e   :  { %2105 = vmatmul.mubr.bf16.vlgmr.msra.gmra.mxu0 %v4080_v5  ;;  %v3778_v5 = vld [vmem:[#allocation6 + $0x160] ss:$8 sps:$4 sm:$0xff]   ;;  %v1848_v1 = vpop.f32.mrf.mxu0 }
 0x11f   :  { %2148 = vmatmul.mubr.bf16.vlgmr.msra.gmra.mxu1 %v4082_v6  ;;  %2615 = vmatpush1.bf16.msra.mxu0 %v3727_v16  ;;  %v3739_v6 = vld [vmem:[#allocation6 + $0x30] ss:$8 sps:$4 sm:$0xff]   ;;  %v1891_v2 = vpop.f32.mrf.mxu1  ;;  %v517_v16 = vrot.slane %v4098_v9, %v516_v10 }
 0x120   :  { %2616 = vmatprep.subr.bf16.mxu0 %v3732_v17  ;;  %2658 = vmatpush1.bf16.msra.mxu1 %v3775_v25  ;;  %v1850_v11 = vpop.f32.mrf.mxu0  ;;  %v3813_v25 = vld [vmem:[#allocation6 + $0x1b4] ss:$8 sps:$4 sm:$0xff]  }
 0x121   :  { %2659 = vmatprep.subr.bf16.mxu1 %v3780_v35  ;;  %v1893_v12 = vpop.f32.mrf.mxu1 }
 0x122   :  { %v1852_v17 = vpop.f32.mrf.mxu0 }
 0x123   :  { %2617 = vmatpush1.bf16.msra.mxu0 %v3730_v19  ;;  %v1895_v19 = vpop.f32.mrf.mxu1  ;;  %v1853_v18 = vadd.f32 %v1852_v17, %v517_v16 }
 0x124   :  { %2618 = vmatprep.subr.bf16.mxu0 %v3735_v20  ;;  %2660 = vmatpush1.bf16.msra.mxu1 %v3778_v5  ;;  %v1851_v20 = vadd.f32 %v1850_v11, %v521_v14  ;;  %v528_v11 = vsub.s32 3, %v3961_v48 }
 0x125   :  { %2661 = vmatprep.subr.bf16.mxu1 %v3783_v21 }
 0x127   :  { %2619 = vmatpush1.bf16.msra.mxu0 %v3733_v22  ;;  %v1849_v22 = vadd.f32 %v1848_v1, %v517_v16  ;;  %v3830_v1 = vld [vmem:[%s4177_s5 + $0x20] sm:$0xff]  }
 0x128   :  { %2620 = vmatprep.subr.bf16.mxu0 %v3738_v23  ;;  %2662 = vmatpush1.bf16.msra.mxu1 %v3781_v27  ;;  %v1854_v23 = vpop.f32.mrf.mxu0 }
 0x129   :  { %2663 = vmatprep.subr.bf16.mxu1 %v3786_v29  ;;  %v1855_v21 = vadd.f32 %v1854_v23, %v521_v14  ;;  %v3816_v29 = vld [vmem:[#allocation6 + $0x1a4] ss:$8 sps:$4 sm:$0xff]  }
 0x12b   :  { %2621 = vmatpush1.bf16.msra.mxu0 %v3736_v24  ;;  %v1897_v24 = vpop.f32.mrf.mxu1 }
 0x12c   :  { %2622 = vmatprep.subr.bf16.mxu0 %v3741_v34  ;;  %2664 = vmatpush1.bf16.msra.mxu1 %v3784_v30  ;;  %v3811_v34 = vld [vmem:[#allocation6 + $0x1b0] ss:$8 sps:$4 sm:$0xff]  }
 0x12d   :  { %2665 = vmatprep.subr.bf16.mxu1 %v3789_v31 }
 0x12f   :  { %2623 = vmatpush1.bf16.msra.mxu0 %v3739_v6  ;;  %v1894_v6 = vadd.f32 %v1893_v12, %v1851_v20  ;;  %v524_v12 = vsub.s32 2, %v3961_v48 }
 0x130   :  { %2624 = vmatprep.subr.bf16.mxu0 %v3744_v26  ;;  %2666 = vmatpush1.bf16.msra.mxu1 %v3787_v33  ;;  %v1892_v26 = vadd.f32 %v1891_v2, %v1849_v22  ;;  %v3831_v2 = vld [vmem:[%s4177_s5 + $0x58] sm:$0xff]  }
 0x131   :  { %2667 = vmatprep.subr.bf16.mxu1 %v3792_v38  ;;  %v525_v16 = vrot.slane %v4098_v9, %v524_v12 }
 0x133   :  { %2625 = vmatpush1.bf16.msra.mxu0 %v3742_v28 }
 0x134   :  { %2626 = vmatprep.subr.bf16.mxu0 %v3747_v36  ;;  %2668 = vmatpush1.bf16.msra.mxu1 %v3790_v40  ;;  %v1896_v36 = vadd.f32 %v1895_v19, %v1853_v18  ;;  %v3819_v40 = vld [vmem:[#allocation6 + $0x194] ss:$8 sps:$4 sm:$0xff]  }
 0x135   :  { %2669 = vmatprep.subr.bf16.mxu1 %v3795_v42 }
 0x137   :  { %2627 = vmatpush1.bf16.msra.mxu0 %v3745_v55  ;;  %v3814_v55 = vld [vmem:[#allocation6 + $0x1a0] ss:$8 sps:$4 sm:$0xff]  }
 0x138   :  { %2628 = vmatprep.subr.bf16.mxu0 %v3750_v32  ;;  %2670 = vmatpush1.bf16.msra.mxu1 %v3793_v44  ;;  %v3817_v44 = vld [vmem:[#allocation6 + $0x190] ss:$8 sps:$4 sm:$0xff]  }
 0x139   :  { %2671 = vmatprep.subr.bf16.mxu1 %v3798_v46 }
 0x13b   :  { %2629 = vmatpush1.bf16.msra.mxu0 %v3748_v37  ;;  %v1898_v37 = vadd.f32 %v1897_v24, %v1855_v21 }
 0x13c   :  { %2630 = vmatprep.subr.bf16.mxu0 %v3753_v39  ;;  %2672 = vmatpush1.bf16.msra.mxu1 %v3796_v49 }
 0x13d   :  { %2673 = vmatprep.subr.bf16.mxu1 %v3801_v51 }
 0x13f   :  { %2631 = vmatpush2.bf16.msra.mxu0 %v3751_v41 }
 0x140   :  { %2632 = vmatprep.subr.bf16.mxu0 %v3756_v43  ;;  %2674 = vmatpush2.bf16.msra.mxu1 %v3799_v53  ;;  %v3820_v53 = vld [vmem:[#allocation6 + $0x180] ss:$8 sps:$4 sm:$0xff]  }
 0x141   :  { %2675 = vmatprep.subr.bf16.mxu1 %v3804_v56 }
 0x143   :  { %2633 = vmatpush2.bf16.msra.mxu0 %v3754_v45 }
 0x144   :  { %2634 = vmatprep.subr.bf16.mxu0 %v3759_v47  ;;  %2676 = vmatpush2.bf16.msra.mxu1 %v3802_v58  ;;  %v3823_v58 = vld [vmem:[%s4177_s5 + $0x78] sm:$0xff]  }
 0x145   :  { %2677 = vmatprep.subr.bf16.mxu1 %v3807_v60  ;;  %v3825_v60 = vld [vmem:[%s4177_s5 + $0x70] sm:$0xff]  }
 0x147   :  { %2635 = vmatpush2.bf16.msra.mxu0 %v3757_v50  ;;  %v3822_v50 = vld [vmem:[#allocation6 + $0x184] ss:$8 sps:$4 sm:$0xff]  }
 0x148   :  { %2636 = vmatprep.subr.bf16.mxu0 %v3762_v52  ;;  %2678 = vmatpush2.bf16.msra.mxu1 %v3805_v62  ;;  %v3827_v62 = vld [vmem:[%s4177_s5 + $0x68] sm:$0xff]  }
 0x149   :  { %2679 = vmatprep.subr.bf16.mxu1 %v3810_v0  ;;  %v3829_v0 = vld [vmem:[%s4177_s5 + $0x60] sm:$0xff]  }
 0x14b   :  { %2637 = vmatpush2.bf16.msra.mxu0 %v3760_v54 }
 0x14c   :  { %2638 = vmatprep.subr.bf16.mxu0 %v3765_v57  ;;  %2680 = vmatpush2.bf16.msra.mxu1 %v3808_v4 }
 0x14d   :  { %2681 = vmatprep.subr.bf16.mxu1 %v3813_v25 }
 0x14f   :  { %2639 = vmatpush2.bf16.msra.mxu0 %v3763_v59  ;;  %v3824_v59 = vld [vmem:[%s4177_s5 + $0x38] sm:$0xff]  }
 0x150   :  { %2640 = vmatprep.subr.bf16.mxu0 %v3768_v61  ;;  %2682 = vmatpush2.bf16.msra.mxu1 %v3811_v34  ;;  %v3826_v61 = vld [vmem:[%s4177_s5 + $0x30] sm:$0xff]  }
 0x151   :  { %2683 = vmatprep.subr.bf16.mxu1 %v3816_v29 }
 0x153   :  { %2641 = vmatpush2.bf16.msra.mxu0 %v3766_v63  ;;  %v3828_v63 = vld [vmem:[%s4177_s5 + $0x28] sm:$0xff]  }
 0x154   :  { %2642 = vmatprep.subr.bf16.mxu0 %v3771_v3  ;;  %2684 = vmatpush2.bf16.msra.mxu1 %v3814_v55  ;;  %v3832_v3 = vld [vmem:[%s4177_s5 + $0x18] sm:$0xff]  }
 0x155   :  { %2685 = vmatprep.subr.bf16.mxu1 %v3819_v40 }
 0x157   :  { %2643 = vmatpush2.bf16.msra.mxu0 %v3769_v8 }
 0x158   :  { %2644 = vmatprep.subr.bf16.mxu0 %v3774_v13  ;;  %2686 = vmatpush2.bf16.msra.mxu1 %v3817_v44 }
 0x159   :  { %2687 = vmatprep.subr.bf16.mxu1 %v3822_v50  ;;  %v3835_v50 = vld [vmem:[%s4177_s5 + $0x48] sm:$0xff]  }
 0x15b   :  { %2645 = vmatpush2.bf16.msra.mxu0 %v3772_v15  ;;  %v529_v15 = vrot.slane %v4098_v9, %v528_v11 }
 0x15c   :  { %2688 = vmatpush2.bf16.msra.mxu1 %v3820_v53  ;;  %3287 = vmatprep.subr.bf16.mxu0 %v3823_v58  ;;  %v3838_v53 = vld [vmem:[%s4177_s5] sm:$0xff]  }
 0x15e   :  { %v1934_v35 = vpop.f32.mrf.mxu0 }
 0x15f   :  { %v1977_v5 = vpop.f32.mrf.mxu1  ;;  %v1935_v31 = vadd.f32 %v1934_v35, %v1892_v26 }
 0x160   :  { %v1936_v27 = vpop.f32.mrf.mxu0 }
 0x161   :  { %v1979_v28 = vpop.f32.mrf.mxu1  ;;  %v1937_v30 = vadd.f32 %v1936_v27, %v1894_v6  ;;  %v1978_v45 = vadd.f32 %v1977_v5, %v1935_v31 }
 0x162   :  { %v1938_v32 = vpop.f32.mrf.mxu0 }
 0x163   :  { %v1981_v33 = vpop.f32.mrf.mxu1  ;;  %v1939_v38 = vadd.f32 %v1938_v32, %v1896_v36  ;;  %v1980_v41 = vadd.f32 %v1979_v28, %v1937_v30  ;;  %v2158_v54 = vmax.f32 %v1978_v45, 0.0 }
 0x164   :  { %v1940_v39 = vpop.f32.mrf.mxu0 }
 0x165   :  { %v1982_v42 = vadd.f32 %v1981_v33, %v1939_v38  ;;  %v1941_v43 = vadd.f32 %v1940_v39, %v1898_v37  ;;  %v1983_v46 = vpop.f32.mrf.mxu1  ;;  %v2159_v51 = vmax.f32 %v1980_v41, 0.0 }
 0x167   :  { %v1984_v47 = vadd.f32 %v1983_v46, %v1941_v43  ;;  %v2162_v49 = vmax.f32 %v1982_v42, 0.0 }
 0x169   :  { %v2163_v52 = vmax.f32 %v1984_v47, 0.0  ;;  %v3281_v57 = vpack.c.bf16 %v2162_v49, %v2158_v54  ;;  %v3833_v47 = vld [vmem:[%s4177_s5 + $0x50] sm:$0xff]  }
 0x16a   :  { %v3834_v49 = vld [vmem:[%s4177_s5 + $0x10] sm:$0xff]  }
 0x16b   :  { %v3282_v56 = vpack.c.bf16 %v2163_v52, %v2159_v51  ;;  %v3836_v51 = vld [vmem:[%s4177_s5 + $0x8] sm:$0xff]   ;;  %v3837_v52 = vld [vmem:[%s4177_s5 + $0x40] sm:$0xff]  }
 0x16d   :  { %2646 = vmatprep.mubr.bf16.mxu0 %v3282_v56 }
 0x16e   :  { %2647 = vmatmul.mubr.bf16.vlgmr.msra.gmra.mxu0 %v3281_v57  ;;  %v2262_v57 = vld [vmem:[%s4176_s4] sm:$0x3] }
 0x16f   :  { %3288 = vmatpush3.bf16.msra.mxu0 %v3824_v59  ;;  %v2271_v59 = vrot.slane %v2262_v57, %v520_v7 }
 0x170   :  { %3289 = vmatprep.subr.bf16.mxu0 %v3825_v60  ;;  %v2267_v60 = vrot.slane %v2262_v57, %v516_v10 }
 0x173   :  { %3290 = vmatpush3.bf16.msra.mxu0 %v3826_v61 }
 0x174   :  { %3291 = vmatprep.subr.bf16.mxu0 %v3827_v62 }
 0x177   :  { %3292 = vmatpush3.bf16.msra.mxu0 %v3828_v63 }
 0x178   :  { %3293 = vmatprep.subr.bf16.mxu0 %v3829_v0 }
 0x17b   :  { %3294 = vmatpush3.bf16.msra.mxu0 %v3830_v1 }
 0x17c   :  { %3295 = vmatprep.subr.bf16.mxu0 %v3831_v2 }
 0x17f   :  { %3296 = vmatpush3.bf16.msra.mxu0 %v3832_v3 }
 0x180   :  { %3297 = vmatprep.subr.bf16.mxu0 %v3833_v47 }
 0x183   :  { %3298 = vmatpush3.bf16.msra.mxu0 %v3834_v49 }
 0x184   :  { %3299 = vmatprep.subr.bf16.mxu0 %v3835_v50 }
 0x187   :  { %3300 = vmatpush3.bf16.msra.mxu0 %v3836_v51 }
 0x188   :  { %3301 = vmatprep.subr.bf16.mxu0 %v3837_v52 }
 0x18b   :  { %3302 = vmatpush3.bf16.msra.mxu0 %v3838_v53 }
 0x19e   :  { %v2020_v4 = vpop.f32.mrf.mxu0 }
 0x19f   :  { %v2063_v8 = vpop.f32.mrf.mxu1  ;;  %v2021_v22 = vadd.f32 %v2020_v4, %v525_v16 }
 0x1a0   :  { %v2022_v13 = vpop.f32.mrf.mxu0 }
 0x1a1   :  { %v2065_v14 = vpop.f32.mrf.mxu1  ;;  %v2023_v20 = vadd.f32 %v2022_v13, %v529_v15  ;;  %v2064_v6 = vadd.f32 %v2063_v8, %v2021_v22 }
 0x1a2   :  { %v2024_v17 = vpop.f32.mrf.mxu0 }
 0x1a3   :  { %v2067_v19 = vpop.f32.mrf.mxu1  ;;  %v2025_v25 = vadd.f32 %v2024_v17, %v525_v16  ;;  %v2066_v35 = vadd.f32 %v2065_v14, %v2023_v20  ;;  %v3256_v20 = vld [vmem:[%s4178_s6] ss:$0 sm:$0xff] }
 0x1a4   :  { %v2026_v23 = vpop.f32.mrf.mxu0 }
 0x1a5   :  { %v2069_v24 = vpop.f32.mrf.mxu1  ;;  %v2027_v5 = vadd.f32 %v2026_v23, %v529_v15  ;;  %v2068_v27 = vadd.f32 %v2067_v19, %v2025_v25 }
 0x1a7   :  { %v2070_v9 = vadd.f32 %v2069_v24, %v2027_v5 }
 0x1de   :  { %v2106_v18 = vpop.f32.mrf.mxu0 }
 0x1df   :  { %v2149_v34 = vpop.f32.mrf.mxu1  ;;  %v2107_v29 = vadd.f32 %v2106_v18, %v2064_v6 }
 0x1e0   :  { %v2108_v21 = vpop.f32.mrf.mxu0 }
 0x1e1   :  { %v2151_v26 = vpop.f32.mrf.mxu1  ;;  %v2109_v28 = vadd.f32 %v2108_v21, %v2066_v35  ;;  %v2150_v38 = vadd.f32 %v2149_v34, %v2107_v29 }
 0x1e2   :  { %v2110_v36 = vpop.f32.mrf.mxu0 }
 0x1e3   :  { %v2153_v30 = vpop.f32.mrf.mxu1  ;;  %v2111_v55 = vadd.f32 %v2110_v36, %v2068_v27  ;;  %v2152_v32 = vadd.f32 %v2151_v26, %v2109_v28  ;;  %v2160_v44 = vmax.f32 %v2150_v38, 0.0 }
 0x1e4   :  { %v2112_v31 = vpop.f32.mrf.mxu0 }
 0x1e5   :  { %v2154_v33 = vadd.f32 %v2153_v30, %v2111_v55  ;;  %v2113_v37 = vadd.f32 %v2112_v31, %v2070_v9  ;;  %v2155_v39 = vpop.f32.mrf.mxu1  ;;  %v2161_v42 = vmax.f32 %v2152_v32, 0.0 }
 0x1e7   :  { %v2156_v40 = vadd.f32 %v2155_v39, %v2113_v37  ;;  %v2164_v41 = vmax.f32 %v2154_v33, 0.0 }
 0x1e9   :  { %v2165_v43 = vmax.f32 %v2156_v40, 0.0  ;;  %v3283_v46 = vpack.c.bf16 %v2164_v41, %v2160_v44 }
 0x1eb   :  { %v3284_v45 = vpack.c.bf16 %v2165_v43, %v2161_v42 }
 0x1ed   :  { %2689 = vmatprep.mubr.bf16.mxu1 %v3284_v45 }
 0x1ee   :  { %2690 = vmatmul.mubr.bf16.vlgmr.msra.gmra.mxu1 %v3283_v46 }
 0x22e   :  { %v2648_v54 = vpop.f32.mrf.mxu0 }
 0x22f   :  { %v2649_v2 = vadd.f32 %v2648_v54, %v2267_v60 }
 0x230   :  { %v2650_v56 = vpop.f32.mrf.mxu0 }
 0x231   :  { %v2651_v0 = vadd.f32 %v2650_v56, %v2271_v59 }
 0x232   :  { %v2652_v58 = vpop.f32.mrf.mxu0 }
 0x233   :  { %v2653_v1 = vadd.f32 %v2652_v58, %v2267_v60 }
 0x234   :  { %v2654_v62 = vpop.f32.mrf.mxu0 }
 0x235   :  { %v2655_v4 = vadd.f32 %v2654_v62, %v2271_v59 }
 0x2ae   :  { %v2691_v61 = vpop.f32.mrf.mxu1 }
 0x2af   :  { %v2692_v12 = vadd.f32 %v2691_v61, %v2649_v2 }
 0x2b0   :  { %v2693_v63 = vpop.f32.mrf.mxu1 }
 0x2b1   :  { %v2694_v8 = vadd.f32 %v2693_v63, %v2651_v0  ;;  %v2700_v7 = vmax.f32 %v2692_v12, 0.0 }
 0x2b2   :  { %v2695_v3 = vpop.f32.mrf.mxu1 }
 0x2b3   :  { %v2696_v11 = vadd.f32 %v2695_v3, %v2653_v1  ;;  %v2701_v16 = vmax.f32 %v2694_v8, 0.0 }
 0x2b4   :  { %v2697_v13 = vpop.f32.mrf.mxu1 }
 0x2b5   :  { %v2698_v14 = vadd.f32 %v2697_v13, %v2655_v4  ;;  %v2702_v15 = vmax.f32 %v2696_v11, 0.0 }
 0x2b7   :  { %v2703_v17 = vmax.f32 %v2698_v14, 0.0  ;;  %v3285_v48 = vpack.c.bf16 %v2702_v15, %v2700_v7 }
 0x2b9   :  { %v3286_v19 = vpack.c.bf16 %v2703_v17, %v2701_v16 }
 0x2bb   :  { %2897 = vmatprep.mubr.bf16.mxu0 %v3286_v19 }
 0x2bc   :  { %2898 = vmatmul.mubr.bf16.vlgmr.msra.gmra.mxu0 %v3285_v48 }
 0x37c   :  { %v3303_v10 = vpop.f32.mrf.mxu0 }
 0x37e   :  { %v3304_v22 = vpop.f32.mrf.mxu0 }
 0x37f   :  { %v3305_v23 = vadd.f32 %v3304_v22, %v3303_v10 }
 0x380   :  { %v3306_v24 = vpop.f32.mrf.mxu0 }
 0x381   :  { %v2900_v25 = vadd.f32 %v3305_v23, %v3256_v20 }
 0x382   :  { %v3307_v18 = vpop.f32.mrf.mxu0 }
 0x383   :  { %2906 = vst [vmem:[#allocation8] sm:$0xff] %v2900_v25  ;;  %v3308_v34 = vadd.f32 %v3307_v18, %v3306_v24 }
 0x385   :  { %v2903_v35 = vadd.f32 %v3308_v34, %v3256_v20 }
 0x387   :  { %2907 = vst [vmem:[#allocation8 + $0x8] sm:$0xff] %v2903_v35 }
 0x388   :  { %2912 = vsyncadd [#allocation5], 224  ;;  %s3912_s27 = smov [#allocation8]  }
 0x389   :  { %s2913_s28 = sshll.u32 %s3912_s27, 4  ;;  %s2914_s28 = int_to_ptr.vmem [resolvable:$true] %s2913_s28 }
 0x38a   :  { %s3879_s29 = scalar_lea.vmem %s2914_s28, 32  ;;  %s3883_s30 = scalar_lea.vmem %s2914_s28, 256 }
 0x38b   :  { %p3880_p10 = scmp.ne.s32.totalorder %s2914_s28, %s3879_s29  ;;  %p3884_p11 = scmp.lt.s32.totalorder %s2914_s28, %s2914_s28 }
 0x38c   :  { %p3885_p12 = scmp.lt.s32.totalorder %s3883_s30, %s3879_s29 }
 0x38e   :  { %p3886_p13 = por %p3885_p12, %p3884_p11 }
 0x390   :  { %p3887_p0 = pnand %p3886_p13, %p3880_p10 }
 0x392   :  { %3890 = shalt.err (!%p3887_p0)
}
 0x393   :  { %s3913_s6 = smov 32   ;;  %s3914_s8 = smov 2  }
 0x394   :  { %2919 = dma.vmem_to_hbm [thread:$0]  %s2914_s28, 32, %s4179_s7, [#allocation5], %s3913_s6, %s3913_s6, %s3914_s8  }
 0x395   :  { %3903 = dma.done.wait [#allocation5], 256  }
 0x396   :  { %3904 = vsyncadd [#allocation5], 4294967040 }
 0x397   :  { %2923 = vsyncpa [#allocation4], 1 }
 0x398   :  { %2924 = vsyncpa [#allocation7], 1 }
 0x399   :  { %2925 = vsyncpa [#allocation5], 1 }

</bundles_post_ra>
